<compile_context>
chip_gen: v5e
topology: v5e:2x2
jax: 0.10.0
libtpu: 0.0.40
codegen_flags: <defaults>
</compile_context>

<pallas_src>
import jax
import jax.numpy as jnp
from jax import lax
from jax.experimental import pallas as pl
from jax.experimental.pallas import tpu as pltpu

# --- small synthetic config (mirrors config.yaml fields) --------------------
N_MELS = 16        # n_mels
HIDDEN = 32        # hidden_size
EMBED = 32         # embedding_size
NUM_LAYERS = 2     # num_layers
BATCH = 2
SEQ = 8


def emotion_encoder_kernel(x_ref,
                           wih0_ref, whh0_ref, b0_ref,
                           wcat1_ref, b1_ref,
                           wlin_ref, blin_ref,
                           out_ref,
                           gx0_ref):
    """Whole forward pass (2-layer LSTM recurrence + linear + relu + L2 norm).

    x_ref:     (T, B, F)   time-major input
    wih0_ref:  (F, 4H)     layer-0 input->gates weight, i/f/o cols pre-scaled 0.5
    whh0_ref:  (H, 4H)     layer-0 hidden->gates weight, pre-scaled likewise
    b0_ref:    (1, 4H)     layer-0 combined bias (b_ih + b_hh), pre-scaled
    wcat1_ref: (2H, 4H)    layer-1 fused [W_ih1; W_hh1], pre-scaled
    b1_ref:    (1, 4H)     layer-1 combined bias, pre-scaled
    wlin_ref:  (H, E), blin_ref: (1, E)
    out_ref:   (B, E)      normalized embeddings
    gx0_ref:   (T, B, 4H)  VMEM scratch: precomputed layer-0 input projection
    """
    T, B, F = x_ref.shape
    H = whh0_ref.shape[0]
    G = 4 * H

    # ---- hoisted weight loads / constants (off the serial chain) ----------
    whh0 = whh0_ref[...]                                   # (H, 4H)
    wcat1 = wcat1_ref[...]                                 # (2H, 4H)
    b1_b = jnp.broadcast_to(b1_ref[...], (B, G))           # bias broadcast, once

    # sigmoid(z) = 0.5 + 0.5*tanh(z/2); i/f/o columns were pre-scaled by 0.5,
    # g columns left as-is, so one full-width tanh covers all four gates.
    lane = lax.broadcasted_iota(jnp.int32, (B, G), 1)
    is_g = (lane >= 2 * H) & (lane < 3 * H)
    alpha = jnp.where(is_g, 1.0, 0.5).astype(jnp.float32)  # (B, 4H)
    beta = jnp.where(is_g, 0.0, 0.5).astype(jnp.float32)   # (B, 4H)

    # ---- layer-0 input projection for ALL timesteps, one big matmul -------
    x2d = x_ref[...].reshape(T * B, F)
    gx0 = jnp.dot(x2d, wih0_ref[...],
                  preferred_element_type=jnp.float32) + b0_ref[...]
    gx0_ref[...] = gx0.reshape(T, B, G)

    def cell_update(gates, c):
        t = jnp.tanh(gates)          # ONE full-width (B, 4H) EUP op
        act = alpha * t + beta       # i/f/o -> sigmoid, g -> tanh
        i = act[:, 0 * H:1 * H]
        f = act[:, 1 * H:2 * H]
        g = act[:, 2 * H:3 * H]
        o = act[:, 3 * H:4 * H]
        c_new = f * c + i * g
        h_new = o * jnp.tanh(c_new)
        return h_new, c_new

    def step(t, carry):
        h0, c0, h1, c1 = carry
        # layer 0: only the recurrent matmul remains on the serial path.
        gates0 = gx0_ref[t] + jnp.dot(h0, whh0,
                                      preferred_element_type=jnp.float32)
        h0, c0 = cell_update(gates0, c0)
        # layer 1: single fused matmul over concat([h0_new, h1]).
        xh = jnp.concatenate([h0, h1], axis=-1)            # (B, 2H)
        gates1 = jnp.dot(xh, wcat1,
                         preferred_element_type=jnp.float32) + b1_b
        h1, c1 = cell_update(gates1, c1)
        return (h0, c0, h1, c1)

    zeros = jnp.zeros((B, H), jnp.float32)
    _, _, h_last, _ = lax.fori_loop(0, T, step,
                                    (zeros, zeros, zeros, zeros),
                                    unroll=True)

    # Linear + ReLU on last layer's final hidden state.
    emb = (jnp.dot(h_last, wlin_ref[...], preferred_element_type=jnp.float32)
           + blin_ref[...])
    emb = jnp.maximum(emb, 0.0)

    # L2 normalization with +1e-5 in the denominator (matches torch.norm + eps).
    norm = jnp.sqrt(jnp.sum(emb * emb, axis=1, keepdims=True))
    out_ref[...] = emb * pl.reciprocal(norm + 1e-5, approx=True)


def emotion_encoder_forward(x, kp):
    """x: (B, T, n_mels) float32 (batch-first, like the PyTorch module)."""
    B, T, F = x.shape
    x_tm = jnp.transpose(x, (1, 0, 2))  # -> (T, B, F) time-major for the kernel
    vmem = pl.BlockSpec(memory_space=pltpu.MemorySpace.VMEM)
    return pl.pallas_call(
        emotion_encoder_kernel,
        out_shape=jax.ShapeDtypeStruct((B, EMBED), jnp.float32),
        in_specs=[vmem] * 8,
        out_specs=vmem,
        scratch_shapes=[pltpu.VMEM((T, B, 4 * HIDDEN), jnp.float32)],
    )(x_tm,
      kp["wih0"], kp["whh0"], kp["b0"],
      kp["wcat1"], kp["b1"],
      kp["wlin"], kp["blin"])


def init_pt_params(key):
    """Deterministic synthetic parameters with PyTorch tensor shapes."""
    ks = jax.random.split(key, 10)
    s = 0.1
    return {
        # nn.LSTM: weight_ih_l0 (4H, F), weight_hh_l0 (4H, H), biases (4H,)
        "w_ih0": s * jax.random.normal(ks[0], (4 * HIDDEN, N_MELS), jnp.float32),
        "w_hh0": s * jax.random.normal(ks[1], (4 * HIDDEN, HIDDEN), jnp.float32),
        "b_ih0": s * jax.random.normal(ks[2], (4 * HIDDEN,), jnp.float32),
        "b_hh0": s * jax.random.normal(ks[3], (4 * HIDDEN,), jnp.float32),
        "w_ih1": s * jax.random.normal(ks[4], (4 * HIDDEN, HIDDEN), jnp.float32),
        "w_hh1": s * jax.random.normal(ks[5], (4 * HIDDEN, HIDDEN), jnp.float32),
        "b_ih1": s * jax.random.normal(ks[6], (4 * HIDDEN,), jnp.float32),
        "b_hh1": s * jax.random.normal(ks[7], (4 * HIDDEN,), jnp.float32),
        # nn.Linear: weight (E, H), bias (E,)
        "w_lin": s * jax.random.normal(ks[8], (EMBED, HIDDEN), jnp.float32),
        "b_lin": s * jax.random.normal(ks[9], (EMBED,), jnp.float32),
    }


def prepare_kernel_params(pt):
    """Transpose / fuse / pre-scale PyTorch-shaped params for the kernel.

    i/f/o gate columns are scaled by 0.5 so the kernel can use a single
    full-width tanh: sigmoid(z) = 0.5 + 0.5*tanh(0.5*z).
    """
    H = HIDDEN
    col_scale = jnp.concatenate([
        jnp.full((H,), 0.5, jnp.float32),   # i
        jnp.full((H,), 0.5, jnp.float32),   # f
        jnp.ones((H,), jnp.float32),        # g (tanh gate, unscaled)
        jnp.full((H,), 0.5, jnp.float32),   # o
    ])
    wih0 = pt["w_ih0"].T * col_scale                           # (F, 4H)
    whh0 = pt["w_hh0"].T * col_scale                           # (H, 4H)
    b0 = ((pt["b_ih0"] + pt["b_hh0"]) * col_scale)[None, :]    # (1, 4H)
    wcat1 = jnp.concatenate([pt["w_ih1"].T, pt["w_hh1"].T],
                            axis=0) * col_scale                # (2H, 4H)
    b1 = ((pt["b_ih1"] + pt["b_hh1"]) * col_scale)[None, :]    # (1, 4H)
    return {
        "wih0": wih0, "whh0": whh0, "b0": b0,
        "wcat1": wcat1, "b1": b1,
        "wlin": pt["w_lin"].T, "blin": pt["b_lin"][None, :],
    }


def reference_forward(x, pt):
    """Pure-JAX reference of the PyTorch forward (standard sigmoid/tanh LSTM)."""
    B, T, F = x.shape
    H = HIDDEN

    def cell(x_t, h, c, w_ih, w_hh, b_ih, b_hh):
        gates = x_t @ w_ih.T + h @ w_hh.T + b_ih + b_hh
        i = jax.nn.sigmoid(gates[:, 0 * H:1 * H])
        f = jax.nn.sigmoid(gates[:, 1 * H:2 * H])
        g = jnp.tanh(gates[:, 2 * H:3 * H])
        o = jax.nn.sigmoid(gates[:, 3 * H:4 * H])
        c = f * c + i * g
        h = o * jnp.tanh(c)
        return h, c

    def step(carry, x_t):
        h0, c0, h1, c1 = carry
        h0, c0 = cell(x_t, h0, c0, pt["w_ih0"], pt["w_hh0"],
                      pt["b_ih0"], pt["b_hh0"])
        h1, c1 = cell(h0, h1, c1, pt["w_ih1"], pt["w_hh1"],
                      pt["b_ih1"], pt["b_hh1"])
        return (h0, c0, h1, c1), None

    zeros = jnp.zeros((B, H), jnp.float32)
    (h0, c0, h1, c1), _ = lax.scan(step, (zeros, zeros, zeros, zeros),
                                   jnp.transpose(x, (1, 0, 2)))
    emb = jnp.maximum(h1 @ pt["w_lin"].T + pt["b_lin"], 0.0)
    norm = jnp.sqrt(jnp.sum(emb * emb, axis=1, keepdims=True))
    return emb / (norm + 1e-5)


if __name__ == "__main__":
    key = jax.random.PRNGKey(0)
    k_x, k_p = jax.random.split(key)
    x = jax.random.normal(k_x, (BATCH, SEQ, N_MELS), jnp.float32)

    pt_params = init_pt_params(k_p)
    kernel_params = prepare_kernel_params(pt_params)

    out = emotion_encoder_forward(x, kernel_params)
    out = jax.block_until_ready(out)

    ref = reference_forward(x, pt_params)
    assert out.shape == (BATCH, EMBED)
    # tolerance covers default-precision MXU passes + approx reciprocal;
    # any semantic bug (gate order, bias fold, scaling) would be >> this.
    assert jnp.allclose(out, ref, atol=2e-3, rtol=2e-3), "mismatch vs reference"

    print("KERNEL_OK")
</pallas_src>

<mosaic_0001>
module attributes {stable_mosaic.version = 11 : i64} {
  func.func @emotion_encoder_kernel(%arg0: memref<8x2x16xf32, #tpu.memory_space<vmem>>, %arg1: memref<16x128xf32, #tpu.memory_space<vmem>>, %arg2: memref<32x128xf32, #tpu.memory_space<vmem>>, %arg3: memref<1x128xf32, #tpu.memory_space<vmem>>, %arg4: memref<64x128xf32, #tpu.memory_space<vmem>>, %arg5: memref<1x128xf32, #tpu.memory_space<vmem>>, %arg6: memref<32x32xf32, #tpu.memory_space<vmem>>, %arg7: memref<1x32xf32, #tpu.memory_space<vmem>>, %arg8: memref<2x32xf32, #tpu.memory_space<vmem>>, %arg9: memref<8x2x128xf32, #tpu.memory_space<vmem>>) attributes {dimension_semantics = [], scalar_prefetch = 0 : i64, scratch_operands = 1 : i64, tpu.core_type = #tpu.core_type<tc>} {
    %c0 = arith.constant 0 : index
    %c0_0 = arith.constant 0 : index
    %0 = vector.load %arg2[%c0, %c0_0] : memref<32x128xf32, #tpu.memory_space<vmem>>, vector<32x128xf32>
    %c0_1 = arith.constant 0 : index
    %c0_2 = arith.constant 0 : index
    %1 = vector.load %arg4[%c0_1, %c0_2] : memref<64x128xf32, #tpu.memory_space<vmem>>, vector<64x128xf32>
    %c0_3 = arith.constant 0 : index
    %c0_4 = arith.constant 0 : index
    %2 = vector.load %arg5[%c0_3, %c0_4] : memref<1x128xf32, #tpu.memory_space<vmem>>, vector<1x128xf32>
    %3 = vector.shape_cast %2 : vector<1x128xf32> to vector<1x128xf32>
    %4 = vector.broadcast %3 : vector<1x128xf32> to vector<2x128xf32>
    %5 = tpu.iota {dimensions = array<i32: 1>} : vector<2x128xi32>
    %c64_i32 = arith.constant 64 : i32
    %6 = vector.broadcast %c64_i32 : i32 to vector<2x128xi32>
    %7 = arith.cmpi sge, %5, %6 : vector<2x128xi32>
    %c96_i32 = arith.constant 96 : i32
    %8 = vector.broadcast %c96_i32 : i32 to vector<2x128xi32>
    %9 = arith.cmpi slt, %5, %8 : vector<2x128xi32>
    %10 = arith.andi %7, %9 : vector<2x128xi1>
    %cst = arith.constant 1.000000e+00 : f32
    %cst_5 = arith.constant 5.000000e-01 : f32
    %11 = vector.broadcast %cst : f32 to vector<2x128xf32>
    %12 = vector.broadcast %cst_5 : f32 to vector<2x128xf32>
    %13 = arith.select %10, %11, %12 : vector<2x128xi1>, vector<2x128xf32>
    %cst_6 = arith.constant 0.000000e+00 : f32
    %cst_7 = arith.constant 5.000000e-01 : f32
    %14 = vector.broadcast %cst_6 : f32 to vector<2x128xf32>
    %15 = vector.broadcast %cst_7 : f32 to vector<2x128xf32>
    %16 = arith.select %10, %14, %15 : vector<2x128xi1>, vector<2x128xf32>
    %c0_8 = arith.constant 0 : index
    %c0_9 = arith.constant 0 : index
    %c0_10 = arith.constant 0 : index
    %17 = vector.load %arg0[%c0_8, %c0_9, %c0_10] : memref<8x2x16xf32, #tpu.memory_space<vmem>>, vector<8x2x16xf32>
    %18 = vector.shape_cast %17 : vector<8x2x16xf32> to vector<16x16xf32>
    %c0_11 = arith.constant 0 : index
    %c0_12 = arith.constant 0 : index
    %19 = vector.load %arg1[%c0_11, %c0_12] : memref<16x128xf32, #tpu.memory_space<vmem>>, vector<16x128xf32>
    %cst_13 = arith.constant dense<0.000000e+00> : vector<16x128xf32>
    %20 = tpu.matmul %18, %19, %cst_13 {dimension_numbers = #tpu.dot_dimension_numbers<[1], [0], [0], [1], [0, 0, 1, 1], [], []>} : vector<16x16xf32>, vector<16x128xf32>, vector<16x128xf32> -> vector<16x128xf32>
    %c0_14 = arith.constant 0 : index
    %c0_15 = arith.constant 0 : index
    %21 = vector.load %arg3[%c0_14, %c0_15] : memref<1x128xf32, #tpu.memory_space<vmem>>, vector<1x128xf32>
    %22 = vector.broadcast %21 : vector<1x128xf32> to vector<16x128xf32>
    %23 = arith.addf %20, %22 : vector<16x128xf32>
    %24 = vector.shape_cast %23 : vector<16x128xf32> to vector<8x2x128xf32>
    %c0_16 = arith.constant 0 : index
    %c0_17 = arith.constant 0 : index
    %c0_18 = arith.constant 0 : index
    %25 = vector.load %arg9[%c0_16, %c0_17, %c0_18] : memref<8x2x128xf32, #tpu.memory_space<vmem>>, vector<8x2x128xf32>
    tpu.vector_store %arg9[%c0_16, %c0_17, %c0_18], %24 {strides = array<i32>} : memref<8x2x128xf32, #tpu.memory_space<vmem>>, vector<8x2x128xf32>,
    %cst_19 = arith.constant 0.000000e+00 : f32
    %26 = vector.broadcast %cst_19 : f32 to vector<2x32xf32>
    %c0_i32 = arith.constant 0 : i32
    %27 = arith.index_cast %c0_i32 : i32 to index
    %c0_20 = arith.constant 0 : index
    %c0_21 = arith.constant 0 : index
    %28 = vector.load %arg9[%27, %c0_20, %c0_21] : memref<8x2x128xf32, #tpu.memory_space<vmem>>, vector<1x2x128xf32>
    %29 = vector.shape_cast %28 : vector<1x2x128xf32> to vector<2x128xf32>
    %cst_22 = arith.constant dense<0.000000e+00> : vector<2x128xf32>
    %30 = tpu.matmul %26, %0, %cst_22 {dimension_numbers = #tpu.dot_dimension_numbers<[1], [0], [0], [1], [0, 0, 1, 1], [], []>} : vector<2x32xf32>, vector<32x128xf32>, vector<2x128xf32> -> vector<2x128xf32>
    %31 = arith.addf %29, %30 : vector<2x128xf32>
    %32 = math.tanh %31 : vector<2x128xf32>
    %33 = arith.mulf %13, %32 : vector<2x128xf32>
    %34 = arith.addf %33, %16 : vector<2x128xf32>
    %35 = vector.extract_strided_slice %34 {offsets = [0, 0], sizes = [2, 32], strides = [1, 1]} : vector<2x128xf32> to vector<2x32xf32>
    %36 = vector.extract_strided_slice %34 {offsets = [0, 32], sizes = [2, 32], strides = [1, 1]} : vector<2x128xf32> to vector<2x32xf32>
    %37 = vector.extract_strided_slice %34 {offsets = [0, 64], sizes = [2, 32], strides = [1, 1]} : vector<2x128xf32> to vector<2x32xf32>
    %38 = vector.extract_strided_slice %34 {offsets = [0, 96], sizes = [2, 32], strides = [1, 1]} : vector<2x128xf32> to vector<2x32xf32>
    %39 = arith.mulf %36, %26 : vector<2x32xf32>
    %40 = arith.mulf %35, %37 : vector<2x32xf32>
    %41 = arith.addf %39, %40 : vector<2x32xf32>
    %42 = math.tanh %41 : vector<2x32xf32>
    %43 = arith.mulf %38, %42 : vector<2x32xf32>
    %44 = tpu.concatenate %43, %26 in 1 : vector<2x32xf32>, vector<2x32xf32> -> vector<2x64xf32>
    %cst_23 = arith.constant dense<0.000000e+00> : vector<2x128xf32>
    %45 = tpu.matmul %44, %1, %cst_23 {dimension_numbers = #tpu.dot_dimension_numbers<[1], [0], [0], [1], [0, 0, 1, 1], [], []>} : vector<2x64xf32>, vector<64x128xf32>, vector<2x128xf32> -> vector<2x128xf32>
    %46 = arith.addf %45, %4 : vector<2x128xf32>
    %47 = math.tanh %46 : vector<2x128xf32>
    %48 = arith.mulf %13, %47 : vector<2x128xf32>
    %49 = arith.addf %48, %16 : vector<2x128xf32>
    %50 = vector.extract_strided_slice %49 {offsets = [0, 0], sizes = [2, 32], strides = [1, 1]} : vector<2x128xf32> to vector<2x32xf32>
    %51 = vector.extract_strided_slice %49 {offsets = [0, 32], sizes = [2, 32], strides = [1, 1]} : vector<2x128xf32> to vector<2x32xf32>
    %52 = vector.extract_strided_slice %49 {offsets = [0, 64], sizes = [2, 32], strides = [1, 1]} : vector<2x128xf32> to vector<2x32xf32>
    %53 = vector.extract_strided_slice %49 {offsets = [0, 96], sizes = [2, 32], strides = [1, 1]} : vector<2x128xf32> to vector<2x32xf32>
    %54 = arith.mulf %51, %26 : vector<2x32xf32>
    %55 = arith.mulf %50, %52 : vector<2x32xf32>
    %56 = arith.addf %54, %55 : vector<2x32xf32>
    %57 = math.tanh %56 : vector<2x32xf32>
    %58 = arith.mulf %53, %57 : vector<2x32xf32>
    %c1_i32 = arith.constant 1 : i32
    %59 = arith.index_cast %c1_i32 : i32 to index
    %c0_24 = arith.constant 0 : index
    %c0_25 = arith.constant 0 : index
    %60 = vector.load %arg9[%59, %c0_24, %c0_25] : memref<8x2x128xf32, #tpu.memory_space<vmem>>, vector<1x2x128xf32>
    %61 = vector.shape_cast %60 : vector<1x2x128xf32> to vector<2x128xf32>
    %cst_26 = arith.constant dense<0.000000e+00> : vector<2x128xf32>
    %62 = tpu.matmul %43, %0, %cst_26 {dimension_numbers = #tpu.dot_dimension_numbers<[1], [0], [0], [1], [0, 0, 1, 1], [], []>} : vector<2x32xf32>, vector<32x128xf32>, vector<2x128xf32> -> vector<2x128xf32>
    %63 = arith.addf %61, %62 : vector<2x128xf32>
    %64 = math.tanh %63 : vector<2x128xf32>
    %65 = arith.mulf %13, %64 : vector<2x128xf32>
    %66 = arith.addf %65, %16 : vector<2x128xf32>
    %67 = vector.extract_strided_slice %66 {offsets = [0, 0], sizes = [2, 32], strides = [1, 1]} : vector<2x128xf32> to vector<2x32xf32>
    %68 = vector.extract_strided_slice %66 {offsets = [0, 32], sizes = [2, 32], strides = [1, 1]} : vector<2x128xf32> to vector<2x32xf32>
    %69 = vector.extract_strided_slice %66 {offsets = [0, 64], sizes = [2, 32], strides = [1, 1]} : vector<2x128xf32> to vector<2x32xf32>
    %70 = vector.extract_strided_slice %66 {offsets = [0, 96], sizes = [2, 32], strides = [1, 1]} : vector<2x128xf32> to vector<2x32xf32>
    %71 = arith.mulf %68, %41 : vector<2x32xf32>
    %72 = arith.mulf %67, %69 : vector<2x32xf32>
    %73 = arith.addf %71, %72 : vector<2x32xf32>
    %74 = math.tanh %73 : vector<2x32xf32>
    %75 = arith.mulf %70, %74 : vector<2x32xf32>
    %76 = tpu.concatenate %75, %58 in 1 : vector<2x32xf32>, vector<2x32xf32> -> vector<2x64xf32>
    %cst_27 = arith.constant dense<0.000000e+00> : vector<2x128xf32>
    %77 = tpu.matmul %76, %1, %cst_27 {dimension_numbers = #tpu.dot_dimension_numbers<[1], [0], [0], [1], [0, 0, 1, 1], [], []>} : vector<2x64xf32>, vector<64x128xf32>, vector<2x128xf32> -> vector<2x128xf32>
    %78 = arith.addf %77, %4 : vector<2x128xf32>
    %79 = math.tanh %78 : vector<2x128xf32>
    %80 = arith.mulf %13, %79 : vector<2x128xf32>
    %81 = arith.addf %80, %16 : vector<2x128xf32>
    %82 = vector.extract_strided_slice %81 {offsets = [0, 0], sizes = [2, 32], strides = [1, 1]} : vector<2x128xf32> to vector<2x32xf32>
    %83 = vector.extract_strided_slice %81 {offsets = [0, 32], sizes = [2, 32], strides = [1, 1]} : vector<2x128xf32> to vector<2x32xf32>
    %84 = vector.extract_strided_slice %81 {offsets = [0, 64], sizes = [2, 32], strides = [1, 1]} : vector<2x128xf32> to vector<2x32xf32>
    %85 = vector.extract_strided_slice %81 {offsets = [0, 96], sizes = [2, 32], strides = [1, 1]} : vector<2x128xf32> to vector<2x32xf32>
    %86 = arith.mulf %83, %56 : vector<2x32xf32>
    %87 = arith.mulf %82, %84 : vector<2x32xf32>
    %88 = arith.addf %86, %87 : vector<2x32xf32>
    %89 = math.tanh %88 : vector<2x32xf32>
    %90 = arith.mulf %85, %89 : vector<2x32xf32>
    %c2_i32 = arith.constant 2 : i32
    %91 = arith.index_cast %c2_i32 : i32 to index
    %c0_28 = arith.constant 0 : index
    %c0_29 = arith.constant 0 : index
    %92 = vector.load %arg9[%91, %c0_28, %c0_29] : memref<8x2x128xf32, #tpu.memory_space<vmem>>, vector<1x2x128xf32>
    %93 = vector.shape_cast %92 : vector<1x2x128xf32> to vector<2x128xf32>
    %cst_30 = arith.constant dense<0.000000e+00> : vector<2x128xf32>
    %94 = tpu.matmul %75, %0, %cst_30 {dimension_numbers = #tpu.dot_dimension_numbers<[1], [0], [0], [1], [0, 0, 1, 1], [], []>} : vector<2x32xf32>, vector<32x128xf32>, vector<2x128xf32> -> vector<2x128xf32>
    %95 = arith.addf %93, %94 : vector<2x128xf32>
    %96 = math.tanh %95 : vector<2x128xf32>
    %97 = arith.mulf %13, %96 : vector<2x128xf32>
    %98 = arith.addf %97, %16 : vector<2x128xf32>
    %99 = vector.extract_strided_slice %98 {offsets = [0, 0], sizes = [2, 32], strides = [1, 1]} : vector<2x128xf32> to vector<2x32xf32>
    %100 = vector.extract_strided_slice %98 {offsets = [0, 32], sizes = [2, 32], strides = [1, 1]} : vector<2x128xf32> to vector<2x32xf32>
    %101 = vector.extract_strided_slice %98 {offsets = [0, 64], sizes = [2, 32], strides = [1, 1]} : vector<2x128xf32> to vector<2x32xf32>
    %102 = vector.extract_strided_slice %98 {offsets = [0, 96], sizes = [2, 32], strides = [1, 1]} : vector<2x128xf32> to vector<2x32xf32>
    %103 = arith.mulf %100, %73 : vector<2x32xf32>
    %104 = arith.mulf %99, %101 : vector<2x32xf32>
    %105 = arith.addf %103, %104 : vector<2x32xf32>
    %106 = math.tanh %105 : vector<2x32xf32>
    %107 = arith.mulf %102, %106 : vector<2x32xf32>
    %108 = tpu.concatenate %107, %90 in 1 : vector<2x32xf32>, vector<2x32xf32> -> vector<2x64xf32>
    %cst_31 = arith.constant dense<0.000000e+00> : vector<2x128xf32>
    %109 = tpu.matmul %108, %1, %cst_31 {dimension_numbers = #tpu.dot_dimension_numbers<[1], [0], [0], [1], [0, 0, 1, 1], [], []>} : vector<2x64xf32>, vector<64x128xf32>, vector<2x128xf32> -> vector<2x128xf32>
    %110 = arith.addf %109, %4 : vector<2x128xf32>
    %111 = math.tanh %110 : vector<2x128xf32>
    %112 = arith.mulf %13, %111 : vector<2x128xf32>
    %113 = arith.addf %112, %16 : vector<2x128xf32>
    %114 = vector.extract_strided_slice %113 {offsets = [0, 0], sizes = [2, 32], strides = [1, 1]} : vector<2x128xf32> to vector<2x32xf32>
    %115 = vector.extract_strided_slice %113 {offsets = [0, 32], sizes = [2, 32], strides = [1, 1]} : vector<2x128xf32> to vector<2x32xf32>
    %116 = vector.extract_strided_slice %113 {offsets = [0, 64], sizes = [2, 32], strides = [1, 1]} : vector<2x128xf32> to vector<2x32xf32>
    %117 = vector.extract_strided_slice %113 {offsets = [0, 96], sizes = [2, 32], strides = [1, 1]} : vector<2x128xf32> to vector<2x32xf32>
    %118 = arith.mulf %115, %88 : vector<2x32xf32>
    %119 = arith.mulf %114, %116 : vector<2x32xf32>
    %120 = arith.addf %118, %119 : vector<2x32xf32>
    %121 = math.tanh %120 : vector<2x32xf32>
    %122 = arith.mulf %117, %121 : vector<2x32xf32>
    %c3_i32 = arith.constant 3 : i32
    %123 = arith.index_cast %c3_i32 : i32 to index
    %c0_32 = arith.constant 0 : index
    %c0_33 = arith.constant 0 : index
    %124 = vector.load %arg9[%123, %c0_32, %c0_33] : memref<8x2x128xf32, #tpu.memory_space<vmem>>, vector<1x2x128xf32>
    %125 = vector.shape_cast %124 : vector<1x2x128xf32> to vector<2x128xf32>
    %cst_34 = arith.constant dense<0.000000e+00> : vector<2x128xf32>
    %126 = tpu.matmul %107, %0, %cst_34 {dimension_numbers = #tpu.dot_dimension_numbers<[1], [0], [0], [1], [0, 0, 1, 1], [], []>} : vector<2x32xf32>, vector<32x128xf32>, vector<2x128xf32> -> vector<2x128xf32>
    %127 = arith.addf %125, %126 : vector<2x128xf32>
    %128 = math.tanh %127 : vector<2x128xf32>
    %129 = arith.mulf %13, %128 : vector<2x128xf32>
    %130 = arith.addf %129, %16 : vector<2x128xf32>
    %131 = vector.extract_strided_slice %130 {offsets = [0, 0], sizes = [2, 32], strides = [1, 1]} : vector<2x128xf32> to vector<2x32xf32>
    %132 = vector.extract_strided_slice %130 {offsets = [0, 32], sizes = [2, 32], strides = [1, 1]} : vector<2x128xf32> to vector<2x32xf32>
    %133 = vector.extract_strided_slice %130 {offsets = [0, 64], sizes = [2, 32], strides = [1, 1]} : vector<2x128xf32> to vector<2x32xf32>
    %134 = vector.extract_strided_slice %130 {offsets = [0, 96], sizes = [2, 32], strides = [1, 1]} : vector<2x128xf32> to vector<2x32xf32>
    %135 = arith.mulf %132, %105 : vector<2x32xf32>
    %136 = arith.mulf %131, %133 : vector<2x32xf32>
    %137 = arith.addf %135, %136 : vector<2x32xf32>
    %138 = math.tanh %137 : vector<2x32xf32>
    %139 = arith.mulf %134, %138 : vector<2x32xf32>
    %140 = tpu.concatenate %139, %122 in 1 : vector<2x32xf32>, vector<2x32xf32> -> vector<2x64xf32>
    %cst_35 = arith.constant dense<0.000000e+00> : vector<2x128xf32>
    %141 = tpu.matmul %140, %1, %cst_35 {dimension_numbers = #tpu.dot_dimension_numbers<[1], [0], [0], [1], [0, 0, 1, 1], [], []>} : vector<2x64xf32>, vector<64x128xf32>, vector<2x128xf32> -> vector<2x128xf32>
    %142 = arith.addf %141, %4 : vector<2x128xf32>
    %143 = math.tanh %142 : vector<2x128xf32>
    %144 = arith.mulf %13, %143 : vector<2x128xf32>
    %145 = arith.addf %144, %16 : vector<2x128xf32>
    %146 = vector.extract_strided_slice %145 {offsets = [0, 0], sizes = [2, 32], strides = [1, 1]} : vector<2x128xf32> to vector<2x32xf32>
    %147 = vector.extract_strided_slice %145 {offsets = [0, 32], sizes = [2, 32], strides = [1, 1]} : vector<2x128xf32> to vector<2x32xf32>
    %148 = vector.extract_strided_slice %145 {offsets = [0, 64], sizes = [2, 32], strides = [1, 1]} : vector<2x128xf32> to vector<2x32xf32>
    %149 = vector.extract_strided_slice %145 {offsets = [0, 96], sizes = [2, 32], strides = [1, 1]} : vector<2x128xf32> to vector<2x32xf32>
    %150 = arith.mulf %147, %120 : vector<2x32xf32>
    %151 = arith.mulf %146, %148 : vector<2x32xf32>
    %152 = arith.addf %150, %151 : vector<2x32xf32>
    %153 = math.tanh %152 : vector<2x32xf32>
    %154 = arith.mulf %149, %153 : vector<2x32xf32>
    %c4_i32 = arith.constant 4 : i32
    %155 = arith.index_cast %c4_i32 : i32 to index
    %c0_36 = arith.constant 0 : index
    %c0_37 = arith.constant 0 : index
    %156 = vector.load %arg9[%155, %c0_36, %c0_37] : memref<8x2x128xf32, #tpu.memory_space<vmem>>, vector<1x2x128xf32>
    %157 = vector.shape_cast %156 : vector<1x2x128xf32> to vector<2x128xf32>
    %cst_38 = arith.constant dense<0.000000e+00> : vector<2x128xf32>
    %158 = tpu.matmul %139, %0, %cst_38 {dimension_numbers = #tpu.dot_dimension_numbers<[1], [0], [0], [1], [0, 0, 1, 1], [], []>} : vector<2x32xf32>, vector<32x128xf32>, vector<2x128xf32> -> vector<2x128xf32>
    %159 = arith.addf %157, %158 : vector<2x128xf32>
    %160 = math.tanh %159 : vector<2x128xf32>
    %161 = arith.mulf %13, %160 : vector<2x128xf32>
    %162 = arith.addf %161, %16 : vector<2x128xf32>
    %163 = vector.extract_strided_slice %162 {offsets = [0, 0], sizes = [2, 32], strides = [1, 1]} : vector<2x128xf32> to vector<2x32xf32>
    %164 = vector.extract_strided_slice %162 {offsets = [0, 32], sizes = [2, 32], strides = [1, 1]} : vector<2x128xf32> to vector<2x32xf32>
    %165 = vector.extract_strided_slice %162 {offsets = [0, 64], sizes = [2, 32], strides = [1, 1]} : vector<2x128xf32> to vector<2x32xf32>
    %166 = vector.extract_strided_slice %162 {offsets = [0, 96], sizes = [2, 32], strides = [1, 1]} : vector<2x128xf32> to vector<2x32xf32>
    %167 = arith.mulf %164, %137 : vector<2x32xf32>
    %168 = arith.mulf %163, %165 : vector<2x32xf32>
    %169 = arith.addf %167, %168 : vector<2x32xf32>
    %170 = math.tanh %169 : vector<2x32xf32>
    %171 = arith.mulf %166, %170 : vector<2x32xf32>
    %172 = tpu.concatenate %171, %154 in 1 : vector<2x32xf32>, vector<2x32xf32> -> vector<2x64xf32>
    %cst_39 = arith.constant dense<0.000000e+00> : vector<2x128xf32>
    %173 = tpu.matmul %172, %1, %cst_39 {dimension_numbers = #tpu.dot_dimension_numbers<[1], [0], [0], [1], [0, 0, 1, 1], [], []>} : vector<2x64xf32>, vector<64x128xf32>, vector<2x128xf32> -> vector<2x128xf32>
    %174 = arith.addf %173, %4 : vector<2x128xf32>
    %175 = math.tanh %174 : vector<2x128xf32>
    %176 = arith.mulf %13, %175 : vector<2x128xf32>
    %177 = arith.addf %176, %16 : vector<2x128xf32>
    %178 = vector.extract_strided_slice %177 {offsets = [0, 0], sizes = [2, 32], strides = [1, 1]} : vector<2x128xf32> to vector<2x32xf32>
    %179 = vector.extract_strided_slice %177 {offsets = [0, 32], sizes = [2, 32], strides = [1, 1]} : vector<2x128xf32> to vector<2x32xf32>
    %180 = vector.extract_strided_slice %177 {offsets = [0, 64], sizes = [2, 32], strides = [1, 1]} : vector<2x128xf32> to vector<2x32xf32>
    %181 = vector.extract_strided_slice %177 {offsets = [0, 96], sizes = [2, 32], strides = [1, 1]} : vector<2x128xf32> to vector<2x32xf32>
    %182 = arith.mulf %179, %152 : vector<2x32xf32>
    %183 = arith.mulf %178, %180 : vector<2x32xf32>
    %184 = arith.addf %182, %183 : vector<2x32xf32>
    %185 = math.tanh %184 : vector<2x32xf32>
    %186 = arith.mulf %181, %185 : vector<2x32xf32>
    %c5_i32 = arith.constant 5 : i32
    %187 = arith.index_cast %c5_i32 : i32 to index
    %c0_40 = arith.constant 0 : index
    %c0_41 = arith.constant 0 : index
    %188 = vector.load %arg9[%187, %c0_40, %c0_41] : memref<8x2x128xf32, #tpu.memory_space<vmem>>, vector<1x2x128xf32>
    %189 = vector.shape_cast %188 : vector<1x2x128xf32> to vector<2x128xf32>
    %cst_42 = arith.constant dense<0.000000e+00> : vector<2x128xf32>
    %190 = tpu.matmul %171, %0, %cst_42 {dimension_numbers = #tpu.dot_dimension_numbers<[1], [0], [0], [1], [0, 0, 1, 1], [], []>} : vector<2x32xf32>, vector<32x128xf32>, vector<2x128xf32> -> vector<2x128xf32>
    %191 = arith.addf %189, %190 : vector<2x128xf32>
    %192 = math.tanh %191 : vector<2x128xf32>
    %193 = arith.mulf %13, %192 : vector<2x128xf32>
    %194 = arith.addf %193, %16 : vector<2x128xf32>
    %195 = vector.extract_strided_slice %194 {offsets = [0, 0], sizes = [2, 32], strides = [1, 1]} : vector<2x128xf32> to vector<2x32xf32>
    %196 = vector.extract_strided_slice %194 {offsets = [0, 32], sizes = [2, 32], strides = [1, 1]} : vector<2x128xf32> to vector<2x32xf32>
    %197 = vector.extract_strided_slice %194 {offsets = [0, 64], sizes = [2, 32], strides = [1, 1]} : vector<2x128xf32> to vector<2x32xf32>
    %198 = vector.extract_strided_slice %194 {offsets = [0, 96], sizes = [2, 32], strides = [1, 1]} : vector<2x128xf32> to vector<2x32xf32>
    %199 = arith.mulf %196, %169 : vector<2x32xf32>
    %200 = arith.mulf %195, %197 : vector<2x32xf32>
    %201 = arith.addf %199, %200 : vector<2x32xf32>
    %202 = math.tanh %201 : vector<2x32xf32>
    %203 = arith.mulf %198, %202 : vector<2x32xf32>
    %204 = tpu.concatenate %203, %186 in 1 : vector<2x32xf32>, vector<2x32xf32> -> vector<2x64xf32>
    %cst_43 = arith.constant dense<0.000000e+00> : vector<2x128xf32>
    %205 = tpu.matmul %204, %1, %cst_43 {dimension_numbers = #tpu.dot_dimension_numbers<[1], [0], [0], [1], [0, 0, 1, 1], [], []>} : vector<2x64xf32>, vector<64x128xf32>, vector<2x128xf32> -> vector<2x128xf32>
    %206 = arith.addf %205, %4 : vector<2x128xf32>
    %207 = math.tanh %206 : vector<2x128xf32>
    %208 = arith.mulf %13, %207 : vector<2x128xf32>
    %209 = arith.addf %208, %16 : vector<2x128xf32>
    %210 = vector.extract_strided_slice %209 {offsets = [0, 0], sizes = [2, 32], strides = [1, 1]} : vector<2x128xf32> to vector<2x32xf32>
    %211 = vector.extract_strided_slice %209 {offsets = [0, 32], sizes = [2, 32], strides = [1, 1]} : vector<2x128xf32> to vector<2x32xf32>
    %212 = vector.extract_strided_slice %209 {offsets = [0, 64], sizes = [2, 32], strides = [1, 1]} : vector<2x128xf32> to vector<2x32xf32>
    %213 = vector.extract_strided_slice %209 {offsets = [0, 96], sizes = [2, 32], strides = [1, 1]} : vector<2x128xf32> to vector<2x32xf32>
    %214 = arith.mulf %211, %184 : vector<2x32xf32>
    %215 = arith.mulf %210, %212 : vector<2x32xf32>
    %216 = arith.addf %214, %215 : vector<2x32xf32>
    %217 = math.tanh %216 : vector<2x32xf32>
    %218 = arith.mulf %213, %217 : vector<2x32xf32>
    %c6_i32 = arith.constant 6 : i32
    %219 = arith.index_cast %c6_i32 : i32 to index
    %c0_44 = arith.constant 0 : index
    %c0_45 = arith.constant 0 : index
    %220 = vector.load %arg9[%219, %c0_44, %c0_45] : memref<8x2x128xf32, #tpu.memory_space<vmem>>, vector<1x2x128xf32>
    %221 = vector.shape_cast %220 : vector<1x2x128xf32> to vector<2x128xf32>
    %cst_46 = arith.constant dense<0.000000e+00> : vector<2x128xf32>
    %222 = tpu.matmul %203, %0, %cst_46 {dimension_numbers = #tpu.dot_dimension_numbers<[1], [0], [0], [1], [0, 0, 1, 1], [], []>} : vector<2x32xf32>, vector<32x128xf32>, vector<2x128xf32> -> vector<2x128xf32>
    %223 = arith.addf %221, %222 : vector<2x128xf32>
    %224 = math.tanh %223 : vector<2x128xf32>
    %225 = arith.mulf %13, %224 : vector<2x128xf32>
    %226 = arith.addf %225, %16 : vector<2x128xf32>
    %227 = vector.extract_strided_slice %226 {offsets = [0, 0], sizes = [2, 32], strides = [1, 1]} : vector<2x128xf32> to vector<2x32xf32>
    %228 = vector.extract_strided_slice %226 {offsets = [0, 32], sizes = [2, 32], strides = [1, 1]} : vector<2x128xf32> to vector<2x32xf32>
    %229 = vector.extract_strided_slice %226 {offsets = [0, 64], sizes = [2, 32], strides = [1, 1]} : vector<2x128xf32> to vector<2x32xf32>
    %230 = vector.extract_strided_slice %226 {offsets = [0, 96], sizes = [2, 32], strides = [1, 1]} : vector<2x128xf32> to vector<2x32xf32>
    %231 = arith.mulf %228, %201 : vector<2x32xf32>
    %232 = arith.mulf %227, %229 : vector<2x32xf32>
    %233 = arith.addf %231, %232 : vector<2x32xf32>
    %234 = math.tanh %233 : vector<2x32xf32>
    %235 = arith.mulf %230, %234 : vector<2x32xf32>
    %236 = tpu.concatenate %235, %218 in 1 : vector<2x32xf32>, vector<2x32xf32> -> vector<2x64xf32>
    %cst_47 = arith.constant dense<0.000000e+00> : vector<2x128xf32>
    %237 = tpu.matmul %236, %1, %cst_47 {dimension_numbers = #tpu.dot_dimension_numbers<[1], [0], [0], [1], [0, 0, 1, 1], [], []>} : vector<2x64xf32>, vector<64x128xf32>, vector<2x128xf32> -> vector<2x128xf32>
    %238 = arith.addf %237, %4 : vector<2x128xf32>
    %239 = math.tanh %238 : vector<2x128xf32>
    %240 = arith.mulf %13, %239 : vector<2x128xf32>
    %241 = arith.addf %240, %16 : vector<2x128xf32>
    %242 = vector.extract_strided_slice %241 {offsets = [0, 0], sizes = [2, 32], strides = [1, 1]} : vector<2x128xf32> to vector<2x32xf32>
    %243 = vector.extract_strided_slice %241 {offsets = [0, 32], sizes = [2, 32], strides = [1, 1]} : vector<2x128xf32> to vector<2x32xf32>
    %244 = vector.extract_strided_slice %241 {offsets = [0, 64], sizes = [2, 32], strides = [1, 1]} : vector<2x128xf32> to vector<2x32xf32>
    %245 = vector.extract_strided_slice %241 {offsets = [0, 96], sizes = [2, 32], strides = [1, 1]} : vector<2x128xf32> to vector<2x32xf32>
    %246 = arith.mulf %243, %216 : vector<2x32xf32>
    %247 = arith.mulf %242, %244 : vector<2x32xf32>
    %248 = arith.addf %246, %247 : vector<2x32xf32>
    %249 = math.tanh %248 : vector<2x32xf32>
    %250 = arith.mulf %245, %249 : vector<2x32xf32>
    %c7_i32 = arith.constant 7 : i32
    %251 = arith.index_cast %c7_i32 : i32 to index
    %c0_48 = arith.constant 0 : index
    %c0_49 = arith.constant 0 : index
    %252 = vector.load %arg9[%251, %c0_48, %c0_49] : memref<8x2x128xf32, #tpu.memory_space<vmem>>, vector<1x2x128xf32>
    %253 = vector.shape_cast %252 : vector<1x2x128xf32> to vector<2x128xf32>
    %cst_50 = arith.constant dense<0.000000e+00> : vector<2x128xf32>
    %254 = tpu.matmul %235, %0, %cst_50 {dimension_numbers = #tpu.dot_dimension_numbers<[1], [0], [0], [1], [0, 0, 1, 1], [], []>} : vector<2x32xf32>, vector<32x128xf32>, vector<2x128xf32> -> vector<2x128xf32>
    %255 = arith.addf %253, %254 : vector<2x128xf32>
    %256 = math.tanh %255 : vector<2x128xf32>
    %257 = arith.mulf %13, %256 : vector<2x128xf32>
    %258 = arith.addf %257, %16 : vector<2x128xf32>
    %259 = vector.extract_strided_slice %258 {offsets = [0, 0], sizes = [2, 32], strides = [1, 1]} : vector<2x128xf32> to vector<2x32xf32>
    %260 = vector.extract_strided_slice %258 {offsets = [0, 32], sizes = [2, 32], strides = [1, 1]} : vector<2x128xf32> to vector<2x32xf32>
    %261 = vector.extract_strided_slice %258 {offsets = [0, 64], sizes = [2, 32], strides = [1, 1]} : vector<2x128xf32> to vector<2x32xf32>
    %262 = vector.extract_strided_slice %258 {offsets = [0, 96], sizes = [2, 32], strides = [1, 1]} : vector<2x128xf32> to vector<2x32xf32>
    %263 = arith.mulf %260, %233 : vector<2x32xf32>
    %264 = arith.mulf %259, %261 : vector<2x32xf32>
    %265 = arith.addf %263, %264 : vector<2x32xf32>
    %266 = math.tanh %265 : vector<2x32xf32>
    %267 = arith.mulf %262, %266 : vector<2x32xf32>
    %268 = tpu.concatenate %267, %250 in 1 : vector<2x32xf32>, vector<2x32xf32> -> vector<2x64xf32>
    %cst_51 = arith.constant dense<0.000000e+00> : vector<2x128xf32>
    %269 = tpu.matmul %268, %1, %cst_51 {dimension_numbers = #tpu.dot_dimension_numbers<[1], [0], [0], [1], [0, 0, 1, 1], [], []>} : vector<2x64xf32>, vector<64x128xf32>, vector<2x128xf32> -> vector<2x128xf32>
    %270 = arith.addf %269, %4 : vector<2x128xf32>
    %271 = math.tanh %270 : vector<2x128xf32>
    %272 = arith.mulf %13, %271 : vector<2x128xf32>
    %273 = arith.addf %272, %16 : vector<2x128xf32>
    %274 = vector.extract_strided_slice %273 {offsets = [0, 0], sizes = [2, 32], strides = [1, 1]} : vector<2x128xf32> to vector<2x32xf32>
    %275 = vector.extract_strided_slice %273 {offsets = [0, 32], sizes = [2, 32], strides = [1, 1]} : vector<2x128xf32> to vector<2x32xf32>
    %276 = vector.extract_strided_slice %273 {offsets = [0, 64], sizes = [2, 32], strides = [1, 1]} : vector<2x128xf32> to vector<2x32xf32>
    %277 = vector.extract_strided_slice %273 {offsets = [0, 96], sizes = [2, 32], strides = [1, 1]} : vector<2x128xf32> to vector<2x32xf32>
    %278 = arith.mulf %275, %248 : vector<2x32xf32>
    %279 = arith.mulf %274, %276 : vector<2x32xf32>
    %280 = arith.addf %278, %279 : vector<2x32xf32>
    %281 = math.tanh %280 : vector<2x32xf32>
    %282 = arith.mulf %277, %281 : vector<2x32xf32>
    %c8_i32 = arith.constant 8 : i32
    %c0_52 = arith.constant 0 : index
    %c0_53 = arith.constant 0 : index
    %283 = vector.load %arg6[%c0_52, %c0_53] : memref<32x32xf32, #tpu.memory_space<vmem>>, vector<32x32xf32>
    %cst_54 = arith.constant dense<0.000000e+00> : vector<2x32xf32>
    %284 = tpu.matmul %282, %283, %cst_54 {dimension_numbers = #tpu.dot_dimension_numbers<[1], [0], [0], [1], [0, 0, 1, 1], [], []>} : vector<2x32xf32>, vector<32x32xf32>, vector<2x32xf32> -> vector<2x32xf32>
    %c0_55 = arith.constant 0 : index
    %c0_56 = arith.constant 0 : index
    %285 = vector.load %arg7[%c0_55, %c0_56] : memref<1x32xf32, #tpu.memory_space<vmem>>, vector<1x32xf32>
    %286 = vector.broadcast %285 : vector<1x32xf32> to vector<2x32xf32>
    %287 = arith.addf %284, %286 : vector<2x32xf32>
    %cst_57 = arith.constant 0.000000e+00 : f32
    %288 = vector.broadcast %cst_57 : f32 to vector<2x32xf32>
    %289 = arith.maximumf %287, %288 : vector<2x32xf32>
    %290 = arith.mulf %289, %289 : vector<2x32xf32>
    %cst_58 = arith.constant dense<0.000000e+00> : vector<2xf32>
    %291 = vector.multi_reduction <add>, %290, %cst_58 [1] : vector<2x32xf32> to vector<2xf32>
    %292 = vector.shape_cast %291 : vector<2xf32> to vector<2x1xf32>
    %293 = math.sqrt %292 : vector<2x1xf32>
    %cst_59 = arith.constant 9.99999974E-6 : f32
    %294 = vector.broadcast %cst_59 : f32 to vector<2x1xf32>
    %295 = arith.addf %293, %294 : vector<2x1xf32>
    %296 = tpu.reciprocal %295 {approx = true} : vector<2x1xf32> -> vector<2x1xf32>
    %297 = vector.broadcast %296 : vector<2x1xf32> to vector<2x32xf32>
    %298 = arith.mulf %289, %297 : vector<2x32xf32>
    %c0_60 = arith.constant 0 : index
    %c0_61 = arith.constant 0 : index
    %299 = vector.load %arg8[%c0_60, %c0_61] : memref<2x32xf32, #tpu.memory_space<vmem>>, vector<2x32xf32>
    tpu.vector_store %arg8[%c0_60, %c0_61], %298 {strides = array<i32>} : memref<2x32xf32, #tpu.memory_space<vmem>>, vector<2x32xf32>,
    return
  }
}

</mosaic_0001>

<bundles_post_ra>
// kernel: tpu_custom_call.1
= control target key start
LH: loop header
LB: loop body
LE: loop exit
PB: predicated region body
PF: predicated region fallthrough
CT: control target
= control target key end

     0   :  { %13 = vsyncpa [#allocation4], 0  ;;  %s1695_s0 = inlined_call_operand.hbm [shape: f32[8,2,16], index: 0, kind: input, shape index: {}]   ;;  %s1696_s1 = inlined_call_operand.hbm [shape: f32[16,128], index: 1, kind: input, shape index: {}]   ;;  %s1697_s2 = inlined_call_operand.hbm [shape: f32[32,128], index: 2, kind: input, shape index: {}]   ;;  %s1698_s3 = inlined_call_operand.vmem [shape: f32[1,128], index: 3, kind: input, shape index: {}]   ;;  %s1699_s4 = inlined_call_operand.hbm [shape: f32[64,128], index: 4, kind: input, shape index: {}]   ;;  %s1700_s5 = inlined_call_operand.vmem [shape: f32[1,128], index: 5, kind: input, shape index: {}]   ;;  %s1701_s6 = inlined_call_operand.hbm [shape: f32[32,32], index: 6, kind: input, shape index: {}]   ;;  %s1702_s7 = inlined_call_operand.vmem [shape: f32[1,32], index: 7, kind: input, shape index: {}]   ;;  %s1703_s8 = inlined_call_operand.hbm [shape: f32[2,32], index: 8, kind: output, shape index: {}]  }
   0x1   :  { %14 = vsyncpa [#allocation7], 0 }
   0x2   :  { %15 = vsyncpa [#allocation10], 0  ;;  %s34_s29 = sshll.u32 %s1696_s1, 4  ;;  %s35_s29 = int_to_ptr.hbm [resolvable:$true] %s34_s29 }
   0x3   :  { %16 = vsyncpa [#allocation5], 0  ;;  %s1322_s30 = smov [#allocation6]   ;;  %s62_s12 = sshll.u32 %s1699_s4, 4  ;;  %s63_s12 = int_to_ptr.hbm [resolvable:$true] %s62_s12 }
   0x4   :  { %s36_s9 = sshll.u32 %s1322_s30, 4  ;;  %s1323_s13 = smov 128   ;;  %s37_s9 = int_to_ptr.vmem [resolvable:$true] %s36_s9 }
   0x5   :  { %s1324_s14 = smov 8   ;;  %s1325_s15 = smov [#allocation9]  }
   0x6   :  { %42 = dma.hbm_to_vmem [thread:$0]  %s35_s29, 256, %s37_s9, [#allocation7], %s1323_s13, %s1323_s13, %s1324_s14  }
   0x7   :  { %s64_s16 = sshll.u32 %s1325_s15, 4  ;;  %s21_s18 = sshll.u32 %s1695_s0, 4  ;;  %s65_s16 = int_to_ptr.vmem [resolvable:$true] %s64_s16  ;;  %s22_s18 = int_to_ptr.hbm [resolvable:$true] %s21_s18 }
   0x8   :  { %70 = dma.hbm_to_vmem [thread:$0]  %s63_s12, 1024, %s65_s16, [#allocation10], %s1323_s13, %s1323_s13, %s1324_s14  }
   0x9   :  { %s1326_s4 = smov [#allocation3]   ;;  %s47_s22 = sshll.u32 %s1697_s2, 4  ;;  %s48_s22 = int_to_ptr.hbm [resolvable:$true] %s47_s22 }
   0xa   :  { %s23_s19 = sshll.u32 %s1326_s4, 4  ;;  %s1327_s23 = smov 32   ;;  %s24_s19 = int_to_ptr.vmem [resolvable:$true] %s23_s19 }
   0xb   :  { %s1328_s24 = smov 2   ;;  %s1329_s0 = smov [#allocation8]  }
   0xc   :  { %29 = dma.hbm_to_vmem [thread:$0]  %s22_s18, 256, %s24_s19, [#allocation4], %s1327_s23, %s1327_s23, %s1328_s24  }
   0xd   :  { %s49_s25 = sshll.u32 %s1329_s0, 4  ;;  %s77_s28 = sshll.u32 %s1701_s6, 4  ;;  %s50_s25 = int_to_ptr.vmem [resolvable:$true] %s49_s25  ;;  %s78_s28 = int_to_ptr.hbm [resolvable:$true] %s77_s28 }
   0xe   :  { %55 = dma.hbm_to_vmem [thread:$0]  %s48_s22, 512, %s50_s25, [#allocation7], %s1323_s13, %s1323_s13, %s1324_s14  }
   0xf   :  { %s1330_s29 = smov [#allocation11]  }
  0x10   :  { %s79_s2 = sshll.u32 %s1330_s29, 4  ;;  %s80_s2 = int_to_ptr.vmem [resolvable:$true] %s79_s2 }
  0x11   :  { %85 = dma.hbm_to_vmem [thread:$0]  %s78_s28, 512, %s80_s2, [#allocation10], %s1323_s13, %s1323_s13, %s1324_s14  }
  0x12   :  { %1314 = dma.done.wait [#allocation4], 256  }
  0x13   :  { %1315 = vsyncadd [#allocation4], 4294967040 }
  0x14   :  { %1316 = dma.done.wait [#allocation7], 768  }
  0x15   :  { %1317 = vsyncadd [#allocation7], 4294966528 }
  0x16   :  { %1318 = dma.done.wait [#allocation10], 1536  }
  0x17   :  { %1319 = vsyncadd [#allocation10], 4294965760  ;;  %v140_v0 = vld [vmem:[#allocation6 + $0x8] sm:$0xff]  ;;  %v139_v1 = vld [vmem:[#allocation6] sm:$0xff]  ;;  %vm170_vm0 = vcmask 130048   ;;  %v1331_v10 = vmov 0.0   ;;  %v124_v18 = vlaneseq }
  0x18   :  { %v131_v2 = vld [vmem:[#allocation3] sm:$0x3]  ;;  %189 = vmatpush.msra.mxu0 %v140_v0  ;;  %v132_v3 = vld [vmem:[#allocation3 + $0x2] sm:$0x3]  ;;  %v133_v4 = vld [vmem:[#allocation3 + $0x4] sm:$0x3] }
  0x19   :  { %v134_v5 = vld [vmem:[#allocation3 + $0x6] sm:$0x3]  ;;  %153 = vst [vmem:[#allocation1] ss:$4 sm:$0xff] %v131_v2  ;;  %v1409_v6 = vld [vmem:[#allocation8 + $0x18] sm:$0xff]  ;;  %v1411_v7 = vld [vmem:[#allocation8 + $0x10] sm:$0xff] }
  0x1a   :  { %190 = vmatpush.msra.mxu0 %v139_v1  ;;  %155 = vst [vmem:[#allocation1 + $0x1] ss:$4 sm:$0xff] %v132_v3  ;;  %237 = vmatpush.msra.mxu1 %v1409_v6  ;;  %v1414_v8 = vld [vmem:[#allocation8 + $0x8] sm:$0xff]  ;;  %v1418_v9 = vld [vmem:[#allocation8] sm:$0xff]  ;;  %v125_v19 = vand.u32 127, %v124_v18  ;;  %v1332_v23 = vmov 0.5  }
  0x1b   :  { %157 = vst [vmem:[#allocation1 + $0x2] ss:$4 sm:$0xff] %v133_v4  ;;  %331 = vmatpush.msra.mxu3 %v1409_v6  ;;  %v1437_v12 = vld [vmem:[%s1698_s3] ss:$0 sm:$0xff]  ;;  %s1333_s3 = smov 64   ;;  %v1452_v35 = vld [vmem:[#allocation9 + $0x38] sm:$0xff] }
  0x1c   :  { %159 = vst [vmem:[#allocation1 + $0x3] ss:$4 sm:$0xff] %v134_v5  ;;  %238 = vmatpush.msra.mxu1 %v1411_v7  ;;  %vm126_vm1 = vcmp.ge.s32.totalorder %v125_v19, 64  ;;  %vm127_vm2 = vcmp.lt.s32.totalorder %v125_v19, 96  ;;  %v1454_v36 = vld [vmem:[#allocation9 + $0x30] sm:$0xff]  ;;  %283 = vmatpush.msra.mxu2 %v1452_v35  ;;  %v1458_v37 = vld [vmem:[#allocation9 + $0x28] sm:$0xff] }
  0x1d   :  { %332 = vmatpush.msra.mxu3 %v1411_v7  ;;  %vm128_vm3 = vmand %vm126_vm1, %vm127_vm2  ;;  %380 = vmatpush.msrb.mxu0 %v1452_v35  ;;  %v1463_v38 = vld [vmem:[#allocation9 + $0x20] sm:$0xff]  ;;  %v1468_v39 = vld [vmem:[#allocation9 + $0x18] sm:$0xff]  ;;  %vm221_vm4 = vcmask 261120   ;;  %vm271_vm5 = vcmask 523264   ;;  %vm1029_vm6 = vcmask 254976   ;;  %s1056_s15 = sshll.u32 %s1703_s8, 4  ;;  %s1057_s15 = int_to_ptr.hbm [resolvable:$true] %s1056_s15 }
  0x1e   :  { %239 = vmatpush.msra.mxu1 %v1414_v8  ;;  %v1440_v24 = vsel %vm128_vm3, 1.0, %v1332_v23  ;;  %v1442_v26 = vsel %vm128_vm3, 0.0, %v1332_v23  ;;  %284 = vmatpush.msra.mxu2 %v1454_v36  ;;  %v1473_v40 = vld [vmem:[#allocation9 + $0x10] sm:$0xff]  ;;  %v1478_v41 = vld [vmem:[#allocation9 + $0x8] sm:$0xff]  ;;  %v1488_v44 = vld [vmem:[#allocation9] sm:$0xff] }
  0x1f   :  { %333 = vmatpush.msra.mxu3 %v1414_v8  ;;  %381 = vmatpush.msrb.mxu0 %v1454_v36  ;;  %v1519_v47 = vld [vmem:[%s1700_s5] ss:$0 sm:$0xff]  ;;  %v137_v18 = vld [vmem:[#allocation3 + $0xc] sm:$0x3]  ;;  %v138_v19 = vld [vmem:[#allocation3 + $0xe] sm:$0x3] }
  0x20   :  { %240 = vmatpush.msra.mxu1 %v1418_v9  ;;  %285 = vmatpush.msra.mxu2 %v1458_v37  ;;  %165 = vst [vmem:[#allocation1 + $0x22] ss:$4 sm:$0xff] %v137_v18 }
  0x21   :  { %241 = vmatmul.f32.vlgmr.msra.gmra.mxu1 %v1331_v10  ;;  %334 = vmatpush.msra.mxu3 %v1418_v9  ;;  %167 = vst [vmem:[#allocation1 + $0x23] ss:$4 sm:$0xff] %v138_v19 }
  0x22   :  { %428 = vmatpush.msrb.mxu1 %v1409_v6  ;;  %382 = vmatpush.msrb.mxu0 %v1458_v37 }
  0x23   :  { %v168_v11 = vld.sshfl [vmem:[#allocation1] sm:$0xff pattern:$0x73625140]  ;;  %477 = vmatpush.msrb.mxu3 %v1452_v35  ;;  %286 = vmatpush.msra.mxu2 %v1463_v38 }
  0x24   :  { %1068 = vmatmul.msk.f32.vlgmr.msra.gmra.mxu0 %vm170_vm0, %v168_v11  ;;  %429 = vmatpush.msrb.mxu1 %v1411_v7 }
  0x25   :  { %478 = vmatpush.msrb.mxu3 %v1454_v36  ;;  %383 = vmatpush.msrb.mxu0 %v1463_v38 }
  0x26   :  { %430 = vmatpush.msrb.mxu1 %v1414_v8  ;;  %287 = vmatpush.msra.mxu2 %v1468_v39 }
  0x27   :  { %479 = vmatpush.msrb.mxu3 %v1458_v37  ;;  %384 = vmatpush.msrb.mxu0 %v1468_v39 }
  0x28   :  { %431 = vmatpush.msrb.mxu1 %v1418_v9  ;;  %288 = vmatpush.msra.mxu2 %v1473_v40 }
  0x29   :  { %480 = vmatpush.msrb.mxu3 %v1463_v38  ;;  %385 = vmatpush.msrb.mxu0 %v1473_v40 }
  0x2a   :  { %525 = vmatpush.msra.mxu1 %v1409_v6  ;;  %289 = vmatpush.msra.mxu2 %v1478_v41 }
  0x2b   :  { %481 = vmatpush.msrb.mxu3 %v1468_v39  ;;  %386 = vmatpush.msrb.mxu0 %v1478_v41 }
  0x2c   :  { %526 = vmatpush.msra.mxu1 %v1411_v7  ;;  %290 = vmatpush.msra.mxu2 %v1488_v44 }
  0x2d   :  { %482 = vmatpush.msrb.mxu3 %v1473_v40  ;;  %387 = vmatpush.msrb.mxu0 %v1488_v44 }
  0x2e   :  { %527 = vmatpush.msra.mxu1 %v1414_v8  ;;  %574 = vmatpush.msrb.mxu2 %v1452_v35 }
  0x2f   :  { %483 = vmatpush.msrb.mxu3 %v1478_v41  ;;  %622 = vmatpush.msra.mxu0 %v1409_v6 }
  0x30   :  { %528 = vmatpush.msra.mxu1 %v1418_v9  ;;  %575 = vmatpush.msrb.mxu2 %v1454_v36 }
  0x31   :  { %484 = vmatpush.msrb.mxu3 %v1488_v44  ;;  %623 = vmatpush.msra.mxu0 %v1411_v7 }
  0x32   :  { %576 = vmatpush.msrb.mxu2 %v1458_v37 }
  0x33   :  { %624 = vmatpush.msra.mxu0 %v1414_v8 }
  0x34   :  { %577 = vmatpush.msrb.mxu2 %v1463_v38 }
  0x35   :  { %625 = vmatpush.msra.mxu0 %v1418_v9 }
  0x36   :  { %578 = vmatpush.msrb.mxu2 %v1468_v39 }
  0x38   :  { %579 = vmatpush.msrb.mxu2 %v1473_v40 }
  0x3a   :  { %580 = vmatpush.msrb.mxu2 %v1478_v41 }
  0x3c   :  { %581 = vmatpush.msrb.mxu2 %v1488_v44 }
  0x9e   :  { %v242_v20 = vpop.f32.mrf.mxu1 }
  0xa1   :  { %v192_v13 = vpop.f32.mrf.mxu0 }
  0xa2   :  { %v193_v14 = vadd.f32 %v1437_v12, %v192_v13 }
  0xa4   :  { %v200_v15 = vrot.slane %v193_v14, 2  ;;  %v201_v16 = vrot.slane %v193_v14, 4  ;;  %v202_v17 = vrot.slane %v193_v14, 6  ;;  %212 = vst [vmem:[#allocation2] sm:$0x3] %v193_v14 }
  0xa6   :  { %213 = vst [vmem:[#allocation2 + $0x2] sm:$0x3] %v200_v15 }
  0xa7   :  { %214 = vst [vmem:[#allocation2 + $0x4] sm:$0x3] %v201_v16  ;;  %v135_v16 = vld [vmem:[#allocation3 + $0x8] sm:$0x3] }
  0xa8   :  { %215 = vst [vmem:[#allocation2 + $0x6] sm:$0x3] %v202_v17  ;;  %v136_v17 = vld [vmem:[#allocation3 + $0xa] sm:$0x3] }
  0xa9   :  { %161 = vst [vmem:[#allocation1 + $0x20] ss:$4 sm:$0xff] %v135_v16 }
  0xaa   :  { %163 = vst [vmem:[#allocation1 + $0x21] ss:$4 sm:$0xff] %v136_v17 }
  0xab   :  { %v220_v21 = vld [vmem:[#allocation2] sm:$0x3] }
  0xac   :  { %v245_v22 = vadd.f32 %v242_v20, %v220_v21 }
  0xad   :  { %v316_v51 = vld [vmem:[#allocation2 + $0x2] sm:$0x3] }
  0xae   :  { %1102 = vtanh.f32 %v245_v22 }
  0xb1   :  { %v169_v20 = vld.sshfl [vmem:[#allocation1 + $0x20] sm:$0xff pattern:$0x73625140] }
  0xb2   :  { %1069 = vmatmul.msk.f32.gmra.mxu0 %vm170_vm0, %v169_v20 }
  0xb4   :  { %v1103_v25 = vpop.eup %1102 }
  0xb5   :  { %v247_v27 = vmul.f32 %v1103_v25, %v1440_v24 }
  0xb7   :  { %v248_v28 = vadd.f32 %v247_v27, %v1442_v26 }
  0xb9   :  { %251 = vrot.lane.b32.xlu0 %v248_v28, %s1333_s3  ;;  %v249_v31 = vmul.f32 0.0, %v248_v28 }
 0x12b   :  { %v252_v29 = vpop.permute.xlu0 %251 }
 0x12c   :  { %v254_v30 = vmul.f32 %v252_v29, %v248_v28 }
 0x12e   :  { %256 = vrot.lane.b32.xlu0 %v254_v30, %s1327_s23 }
 0x12f   :  { %v195_v25 = vpop.f32.mrf.mxu0 }
 0x130   :  { %v196_v27 = vadd.f32 %v1437_v12, %v195_v25 }
 0x132   :  { %v204_v29 = vrot.slane %v196_v27, 4  ;;  %v205_v30 = vrot.slane %v196_v27, 6  ;;  %216 = vst [vmem:[#allocation2 + $0x8] sm:$0x3] %v196_v27 }
 0x134   :  { %218 = vst [vmem:[#allocation2 + $0xc] sm:$0x3] %v204_v29 }
 0x135   :  { %219 = vst [vmem:[#allocation2 + $0xe] sm:$0x3] %v205_v30 }
 0x1a0   :  { %v257_v32 = vpop.permute.xlu0 %256 }
 0x1a1   :  { %v1448_v33 = vadd.f32 %v257_v32, %v249_v31  ;;  %v413_v31 = vld [vmem:[#allocation2 + $0x4] sm:$0x3] }
 0x1a3   :  { %1104 = vtanh.f32 %v1448_v33 }
 0x1a9   :  { %v1105_v34 = vpop.eup %1104 }
 0x1aa   :  { %262 = vrot.lane.b32.xlu1 %v1105_v34, %s1333_s3 }
 0x21c   :  { %v263_v42 = vpop.permute.xlu1 %262 }
 0x21d   :  { %v265_v43 = vmul.f32 %v263_v42, %v248_v28  ;;  %v203_v28 = vrot.slane %v196_v27, 2 }
 0x21f   :  { %267 = vrot.lane.b32.xlu1 %v265_v43, %s1327_s23  ;;  %217 = vst [vmem:[#allocation2 + $0xa] sm:$0x3] %v203_v28 }
 0x291   :  { %v268_v45 = vpop.permute.xlu1 %267 }
 0x292   :  { %1071 = vmatmul.msk.f32.vlgmr.msra.gmra.mxu3 %vm221_vm4, %v268_v45  ;;  %v270_v46 = vsel %vm221_vm4, %v268_v45, 0.0 }
 0x293   :  { %1070 = vmatmul.msk.f32.vlgmr.msra.gmra.mxu2 %vm271_vm5, %v270_v46  ;;  %719 = vmatpush.msra.mxu3 %v1409_v6 }
 0x294   :  { %816 = vmatpush.msra.mxu2 %v1409_v6 }
 0x295   :  { %720 = vmatpush.msra.mxu3 %v1411_v7 }
 0x296   :  { %817 = vmatpush.msra.mxu2 %v1411_v7 }
 0x297   :  { %721 = vmatpush.msra.mxu3 %v1414_v8 }
 0x298   :  { %818 = vmatpush.msra.mxu2 %v1414_v8 }
 0x299   :  { %722 = vmatpush.msra.mxu3 %v1418_v9 }
 0x29a   :  { %819 = vmatpush.msra.mxu2 %v1418_v9 }
 0x315   :  { %v336_v48 = vpop.f32.mrf.mxu3 }
 0x316   :  { %v292_v49 = vpop.f32.mrf.mxu2  ;;  %v339_v52 = vadd.f32 %v336_v48, %v316_v51 }
 0x317   :  { %v293_v50 = vadd.f32 %v1519_v47, %v292_v49 }
 0x319   :  { %1106 = vtanh.f32 %v293_v50 }
 0x31a   :  { %1108 = vtanh.f32 %v339_v52 }
 0x31f   :  { %v1107_v53 = vpop.eup %1106 }
 0x320   :  { %v296_v54 = vmul.f32 %v1107_v53, %v1440_v24  ;;  %v1109_v56 = vpop.eup %1108 }
 0x321   :  { %v341_v57 = vmul.f32 %v1109_v56, %v1440_v24 }
 0x322   :  { %v297_v55 = vadd.f32 %v296_v54, %v1442_v26 }
 0x323   :  { %v342_v58 = vadd.f32 %v341_v57, %v1442_v26 }
 0x324   :  { %300 = vrot.lane.b32.xlu2 %v297_v55, %s1333_s3  ;;  %v298_v63 = vmul.f32 0.0, %v297_v55 }
 0x325   :  { %v343_v2 = vmul.f32 %v342_v58, %v1448_v33 }
 0x32c   :  { %345 = vrot.lane.b32.xlu2 %v342_v58, %s1333_s3 }
 0x37e   :  { %v301_v59 = vpop.permute.xlu2 %300 }
 0x37f   :  { %v303_v60 = vmul.f32 %v301_v59, %v297_v55 }
 0x381   :  { %305 = vrot.lane.b32.xlu0 %v303_v60, %s1327_s23 }
 0x386   :  { %v346_v61 = vpop.permute.xlu2 %345 }
 0x387   :  { %v348_v62 = vmul.f32 %v346_v61, %v342_v58 }
 0x389   :  { %350 = vrot.lane.b32.xlu1 %v348_v62, %s1327_s23 }
 0x3f3   :  { %v306_v0 = vpop.permute.xlu0 %305 }
 0x3f4   :  { %v1530_v1 = vadd.f32 %v306_v0, %v298_v63 }
 0x3f6   :  { %1110 = vtanh.f32 %v1530_v1 }
 0x3fb   :  { %v351_v3 = vpop.permute.xlu1 %350 }
 0x3fc   :  { %v1111_v4 = vpop.eup %1110  ;;  %v1534_v5 = vadd.f32 %v351_v3, %v343_v2 }
 0x3fd   :  { %311 = vrot.lane.b32.xlu2 %v1111_v4, %s1333_s3 }
 0x3fe   :  { %1112 = vtanh.f32 %v1534_v5 }
 0x404   :  { %v1113_v10 = vpop.eup %1112 }
 0x405   :  { %356 = vrot.lane.b32.xlu0 %v1113_v10, %s1333_s3 }
 0x457   :  { %v312_v11 = vpop.permute.xlu2 %311 }
 0x458   :  { %v314_v13 = vmul.f32 %v312_v11, %v297_v55 }
 0x45a   :  { %365 = vrot.lane.b32.xlu2 %v314_v13, %s1333_s3 }
 0x477   :  { %v357_v14 = vpop.permute.xlu0 %356 }
 0x478   :  { %v359_v15 = vmul.f32 %v357_v14, %v342_v58 }
 0x47a   :  { %361 = vrot.lane.b32.xlu1 %v359_v15, %s1327_s23 }
 0x4b4   :  { %v366_v21 = vpop.permute.xlu2 %365 }
 0x4ec   :  { %v362_v22 = vpop.permute.xlu1 %361 }
 0x4ed   :  { %v368_v23 = vsel %vm221_vm4, %v362_v22, %v366_v21  ;;  %1073 = vmatmul.msk.f32.vlgmr.msrb.gmra.mxu1 %vm221_vm4, %v362_v22 }
 0x4ee   :  { %1072 = vmatmul.msk.f32.vlgmr.msrb.gmra.mxu0 %vm271_vm5, %v368_v23  ;;  %671 = vmatpush.msrb.mxu1 %v1452_v35 }
 0x4ef   :  { %768 = vmatpush.msrb.mxu0 %v1452_v35 }
 0x4f0   :  { %672 = vmatpush.msrb.mxu1 %v1454_v36 }
 0x4f1   :  { %769 = vmatpush.msrb.mxu0 %v1454_v36 }
 0x4f2   :  { %673 = vmatpush.msrb.mxu1 %v1458_v37 }
 0x4f3   :  { %770 = vmatpush.msrb.mxu0 %v1458_v37 }
 0x4f4   :  { %674 = vmatpush.msrb.mxu1 %v1463_v38 }
 0x4f5   :  { %771 = vmatpush.msrb.mxu0 %v1463_v38 }
 0x4f6   :  { %675 = vmatpush.msrb.mxu1 %v1468_v39 }
 0x4f7   :  { %772 = vmatpush.msrb.mxu0 %v1468_v39 }
 0x4f8   :  { %676 = vmatpush.msrb.mxu1 %v1473_v40 }
 0x4f9   :  { %773 = vmatpush.msrb.mxu0 %v1473_v40 }
 0x4fa   :  { %677 = vmatpush.msrb.mxu1 %v1478_v41 }
 0x4fb   :  { %774 = vmatpush.msrb.mxu0 %v1478_v41 }
 0x4fc   :  { %678 = vmatpush.msrb.mxu1 %v1488_v44 }
 0x4fd   :  { %775 = vmatpush.msrb.mxu0 %v1488_v44 }
 0x56a   :  { %v433_v32 = vpop.f32.mrf.mxu1 }
 0x56b   :  { %v436_v33 = vadd.f32 %v433_v32, %v413_v31  ;;  %v389_v34 = vpop.f32.mrf.mxu0 }
 0x56c   :  { %v390_v42 = vadd.f32 %v1519_v47, %v389_v34 }
 0x56d   :  { %1114 = vtanh.f32 %v436_v33 }
 0x56e   :  { %1116 = vtanh.f32 %v390_v42 }
 0x573   :  { %v1115_v43 = vpop.eup %1114 }
 0x574   :  { %v1117_v45 = vpop.eup %1116  ;;  %v438_v46 = vmul.f32 %v1115_v43, %v1440_v24 }
 0x575   :  { %v393_v12 = vmul.f32 %v1117_v45, %v1440_v24 }
 0x576   :  { %v439_v48 = vadd.f32 %v438_v46, %v1442_v26  ;;  %v607_v46 = vld [vmem:[#allocation2 + $0x8] sm:$0x3] }
 0x577   :  { %v394_v49 = vadd.f32 %v393_v12, %v1442_v26 }
 0x578   :  { %442 = vrot.lane.b32.xlu1 %v439_v48, %s1333_s3  ;;  %v440_v58 = vmul.f32 %v439_v48, %v1534_v5 }
 0x579   :  { %397 = vrot.lane.b32.xlu0 %v394_v49, %s1333_s3  ;;  %v395_v54 = vmul.f32 %v394_v49, %v1530_v1 }
 0x5ea   :  { %v443_v50 = vpop.permute.xlu1 %442 }
 0x5eb   :  { %v445_v51 = vmul.f32 %v443_v50, %v439_v48  ;;  %v398_v52 = vpop.permute.xlu0 %397 }
 0x5ec   :  { %v400_v53 = vmul.f32 %v398_v52, %v394_v49 }
 0x5ed   :  { %447 = vrot.lane.b32.xlu0 %v445_v51, %s1327_s23 }
 0x5ee   :  { %402 = vrot.lane.b32.xlu2 %v400_v53, %s1327_s23 }
 0x648   :  { %v403_v55 = vpop.permute.xlu2 %402 }
 0x649   :  { %v405_v56 = vadd.f32 %v403_v55, %v395_v54 }
 0x64b   :  { %1118 = vtanh.f32 %v405_v56 }
 0x651   :  { %v1119_v57 = vpop.eup %1118 }
 0x652   :  { %408 = vrot.lane.b32.xlu1 %v1119_v57, %s1333_s3 }
 0x65f   :  { %v448_v59 = vpop.permute.xlu0 %447 }
 0x660   :  { %v450_v60 = vadd.f32 %v448_v59, %v440_v58 }
 0x662   :  { %1120 = vtanh.f32 %v450_v60 }
 0x668   :  { %v1121_v61 = vpop.eup %1120 }
 0x669   :  { %453 = vrot.lane.b32.xlu2 %v1121_v61, %s1333_s3 }
 0x6c3   :  { %v454_v62 = vpop.permute.xlu2 %453 }
 0x6c4   :  { %v456_v63 = vmul.f32 %v454_v62, %v439_v48  ;;  %v409_v0 = vpop.permute.xlu1 %408 }
 0x6c5   :  { %v411_v2 = vmul.f32 %v409_v0, %v394_v49 }
 0x6c6   :  { %458 = vrot.lane.b32.xlu0 %v456_v63, %s1327_s23 }
 0x6c7   :  { %462 = vrot.lane.b32.xlu1 %v411_v2, %s1333_s3 }
 0x738   :  { %v459_v1 = vpop.permute.xlu0 %458 }
 0x739   :  { %1075 = vmatmul.msk.f32.vlgmr.msra.gmra.mxu1 %vm221_vm4, %v459_v1  ;;  %v463_v3 = vpop.permute.xlu1 %462 }
 0x73a   :  { %v465_v4 = vsel %vm221_vm4, %v459_v1, %v463_v3  ;;  %913 = vmatpush.msra.mxu1 %v1409_v6  ;;  %v510_v6 = vld [vmem:[#allocation2 + $0x6] sm:$0x3] }
 0x73b   :  { %1074 = vmatmul.msk.f32.vlgmr.msrb.gmra.mxu3 %vm271_vm5, %v465_v4  ;;  %v704_v4 = vld [vmem:[#allocation2 + $0xa] sm:$0x3] }
 0x73c   :  { %914 = vmatpush.msra.mxu1 %v1411_v7  ;;  %865 = vmatpush.msrb.mxu3 %v1452_v35 }
 0x73e   :  { %915 = vmatpush.msra.mxu1 %v1414_v8  ;;  %866 = vmatpush.msrb.mxu3 %v1454_v36 }
 0x740   :  { %916 = vmatpush.msra.mxu1 %v1418_v9  ;;  %867 = vmatpush.msrb.mxu3 %v1458_v37 }
 0x742   :  { %868 = vmatpush.msrb.mxu3 %v1463_v38 }
 0x744   :  { %869 = vmatpush.msrb.mxu3 %v1468_v39 }
 0x746   :  { %870 = vmatpush.msrb.mxu3 %v1473_v40 }
 0x748   :  { %871 = vmatpush.msrb.mxu3 %v1478_v41 }
 0x74a   :  { %872 = vmatpush.msrb.mxu3 %v1488_v44 }
 0x7b6   :  { %v530_v7 = vpop.f32.mrf.mxu1 }
 0x7b7   :  { %v533_v5 = vadd.f32 %v530_v7, %v510_v6 }
 0x7b9   :  { %1122 = vtanh.f32 %v533_v5 }
 0x7be   :  { %v486_v8 = vpop.f32.mrf.mxu3 }
 0x7bf   :  { %v1123_v10 = vpop.eup %1122  ;;  %v487_v9 = vadd.f32 %v1519_v47, %v486_v8 }
 0x7c0   :  { %v535_v11 = vmul.f32 %v1123_v10, %v1440_v24 }
 0x7c1   :  { %1124 = vtanh.f32 %v487_v9 }
 0x7c2   :  { %v536_v13 = vadd.f32 %v535_v11, %v1442_v26 }
 0x7c4   :  { %539 = vrot.lane.b32.xlu2 %v536_v13, %s1333_s3  ;;  %v537_v21 = vmul.f32 %v536_v13, %v450_v60 }
 0x7c7   :  { %v1125_v14 = vpop.eup %1124 }
 0x7c8   :  { %v490_v15 = vmul.f32 %v1125_v14, %v1440_v24 }
 0x7ca   :  { %v491_v16 = vadd.f32 %v490_v15, %v1442_v26 }
 0x7cc   :  { %494 = vrot.lane.b32.xlu0 %v491_v16, %s1333_s3  ;;  %v492_v25 = vmul.f32 %v491_v16, %v405_v56 }
 0x81e   :  { %v540_v17 = vpop.permute.xlu2 %539 }
 0x81f   :  { %v542_v18 = vmul.f32 %v540_v17, %v536_v13 }
 0x821   :  { %544 = vrot.lane.b32.xlu1 %v542_v18, %s1327_s23 }
 0x83e   :  { %v495_v19 = vpop.permute.xlu0 %494 }
 0x83f   :  { %v497_v20 = vmul.f32 %v495_v19, %v491_v16 }
 0x841   :  { %499 = vrot.lane.b32.xlu2 %v497_v20, %s1327_s23 }
 0x893   :  { %v545_v22 = vpop.permute.xlu1 %544 }
 0x894   :  { %v547_v23 = vadd.f32 %v545_v22, %v537_v21 }
 0x896   :  { %1126 = vtanh.f32 %v547_v23 }
 0x89b   :  { %v500_v27 = vpop.permute.xlu2 %499 }
 0x89c   :  { %v1127_v28 = vpop.eup %1126  ;;  %v502_v29 = vadd.f32 %v500_v27, %v492_v25 }
 0x89d   :  { %550 = vrot.lane.b32.xlu0 %v1127_v28, %s1333_s3 }
 0x89e   :  { %1128 = vtanh.f32 %v502_v29 }
 0x8a4   :  { %v1129_v30 = vpop.eup %1128 }
 0x8a5   :  { %505 = vrot.lane.b32.xlu1 %v1129_v30, %s1333_s3 }
 0x90f   :  { %v551_v31 = vpop.permute.xlu0 %550 }
 0x910   :  { %v553_v32 = vmul.f32 %v551_v31, %v536_v13 }
 0x912   :  { %555 = vrot.lane.b32.xlu2 %v553_v32, %s1327_s23 }
 0x917   :  { %v506_v33 = vpop.permute.xlu1 %505 }
 0x918   :  { %v508_v34 = vmul.f32 %v506_v33, %v491_v16 }
 0x91a   :  { %559 = vrot.lane.b32.xlu0 %v508_v34, %s1333_s3 }
 0x96c   :  { %v556_v42 = vpop.permute.xlu2 %555 }
 0x96d   :  { %1077 = vmatmul.msk.f32.vlgmr.msra.gmra.mxu0 %vm221_vm4, %v556_v42 }
 0x98c   :  { %v560_v43 = vpop.permute.xlu0 %559 }
 0x98d   :  { %v562_v45 = vsel %vm221_vm4, %v556_v42, %v560_v43 }
 0x98e   :  { %1076 = vmatmul.msk.f32.vlgmr.msrb.gmra.mxu2 %vm271_vm5, %v562_v45  ;;  %v801_v45 = vld [vmem:[#allocation2 + $0xc] sm:$0x3] }
 0x98f   :  { %962 = vmatpush.msrb.mxu2 %v1452_v35 }
 0x991   :  { %963 = vmatpush.msrb.mxu2 %v1454_v36 }
 0x993   :  { %964 = vmatpush.msrb.mxu2 %v1458_v37 }
 0x995   :  { %965 = vmatpush.msrb.mxu2 %v1463_v38 }
 0x997   :  { %966 = vmatpush.msrb.mxu2 %v1468_v39 }
 0x999   :  { %967 = vmatpush.msrb.mxu2 %v1473_v40 }
 0x99b   :  { %968 = vmatpush.msrb.mxu2 %v1478_v41 }
 0x99d   :  { %969 = vmatpush.msrb.mxu2 %v1488_v44 }
 0x9ea   :  { %v627_v12 = vpop.f32.mrf.mxu0 }
 0x9eb   :  { %v630_v48 = vadd.f32 %v627_v12, %v607_v46 }
 0x9ed   :  { %1130 = vtanh.f32 %v630_v48 }
 0x9f3   :  { %v1131_v49 = vpop.eup %1130 }
 0x9f4   :  { %v632_v35 = vmul.f32 %v1131_v49, %v1440_v24 }
 0x9f6   :  { %v633_v36 = vadd.f32 %v632_v35, %v1442_v26 }
 0x9f8   :  { %636 = vrot.lane.b32.xlu1 %v633_v36, %s1333_s3  ;;  %v634_v53 = vmul.f32 %v633_v36, %v547_v23 }
 0xa11   :  { %v583_v37 = vpop.f32.mrf.mxu2 }
 0xa12   :  { %v584_v38 = vadd.f32 %v1519_v47, %v583_v37 }
 0xa14   :  { %1132 = vtanh.f32 %v584_v38 }
 0xa1a   :  { %v1133_v39 = vpop.eup %1132 }
 0xa1b   :  { %v587_v40 = vmul.f32 %v1133_v39, %v1440_v24 }
 0xa1d   :  { %v588_v41 = vadd.f32 %v587_v40, %v1442_v26 }
 0xa1f   :  { %591 = vrot.lane.b32.xlu2 %v588_v41, %s1333_s3  ;;  %v589_v57 = vmul.f32 %v588_v41, %v502_v29 }
 0xa6a   :  { %v637_v44 = vpop.permute.xlu1 %636 }
 0xa6b   :  { %v639_v50 = vmul.f32 %v637_v44, %v633_v36 }
 0xa6d   :  { %641 = vrot.lane.b32.xlu0 %v639_v50, %s1327_s23 }
 0xa79   :  { %v592_v51 = vpop.permute.xlu2 %591 }
 0xa7a   :  { %v594_v52 = vmul.f32 %v592_v51, %v588_v41 }
 0xa7c   :  { %596 = vrot.lane.b32.xlu1 %v594_v52, %s1327_s23 }
 0xadf   :  { %v642_v54 = vpop.permute.xlu0 %641 }
 0xae0   :  { %v644_v55 = vadd.f32 %v642_v54, %v634_v53 }
 0xae2   :  { %1134 = vtanh.f32 %v644_v55 }
 0xae8   :  { %v1135_v56 = vpop.eup %1134 }
 0xae9   :  { %647 = vrot.lane.b32.xlu2 %v1135_v56, %s1333_s3 }
 0xaee   :  { %v597_v58 = vpop.permute.xlu1 %596 }
 0xaef   :  { %v599_v59 = vadd.f32 %v597_v58, %v589_v57 }
 0xaf1   :  { %1136 = vtanh.f32 %v599_v59 }
 0xaf7   :  { %v1137_v60 = vpop.eup %1136 }
 0xaf8   :  { %602 = vrot.lane.b32.xlu0 %v1137_v60, %s1333_s3 }
 0xb43   :  { %v648_v61 = vpop.permute.xlu2 %647 }
 0xb44   :  { %v650_v62 = vmul.f32 %v648_v61, %v633_v36 }
 0xb46   :  { %652 = vrot.lane.b32.xlu1 %v650_v62, %s1327_s23 }
 0xb6a   :  { %v603_v63 = vpop.permute.xlu0 %602 }
 0xb6b   :  { %v605_v0 = vmul.f32 %v603_v63, %v588_v41 }
 0xb6d   :  { %656 = vrot.lane.b32.xlu2 %v605_v0, %s1333_s3 }
 0xbb8   :  { %v653_v2 = vpop.permute.xlu1 %652 }
 0xbb9   :  { %1079 = vmatmul.msk.f32.vlgmr.msra.gmra.mxu3 %vm221_vm4, %v653_v2 }
 0xbc7   :  { %v657_v1 = vpop.permute.xlu2 %656 }
 0xbc8   :  { %v659_v3 = vsel %vm221_vm4, %v653_v2, %v657_v1 }
 0xbc9   :  { %1078 = vmatmul.msk.f32.vlgmr.msrb.gmra.mxu1 %vm271_vm5, %v659_v3  ;;  %v898_v3 = vld [vmem:[#allocation2 + $0xe] sm:$0x3] }
 0xc3c   :  { %v724_v6 = vpop.f32.mrf.mxu3 }
 0xc3d   :  { %v727_v7 = vadd.f32 %v724_v6, %v704_v4 }
 0xc3f   :  { %1138 = vtanh.f32 %v727_v7 }
 0xc45   :  { %v1139_v5 = vpop.eup %1138 }
 0xc46   :  { %v729_v8 = vmul.f32 %v1139_v5, %v1440_v24  ;;  %v680_v10 = vpop.f32.mrf.mxu1 }
 0xc47   :  { %v681_v9 = vadd.f32 %v1519_v47, %v680_v10 }
 0xc48   :  { %v730_v11 = vadd.f32 %v729_v8, %v1442_v26 }
 0xc49   :  { %1140 = vtanh.f32 %v681_v9 }
 0xc4a   :  { %733 = vrot.lane.b32.xlu0 %v730_v11, %s1333_s3  ;;  %v731_v20 = vmul.f32 %v730_v11, %v644_v55 }
 0xc4f   :  { %v1141_v13 = vpop.eup %1140 }
 0xc50   :  { %v684_v14 = vmul.f32 %v1141_v13, %v1440_v24 }
 0xc52   :  { %v685_v15 = vadd.f32 %v684_v14, %v1442_v26 }
 0xc54   :  { %688 = vrot.lane.b32.xlu1 %v685_v15, %s1333_s3  ;;  %v686_v25 = vmul.f32 %v685_v15, %v599_v59 }
 0xcbc   :  { %v734_v16 = vpop.permute.xlu0 %733 }
 0xcbd   :  { %v736_v17 = vmul.f32 %v734_v16, %v730_v11 }
 0xcbf   :  { %738 = vrot.lane.b32.xlu2 %v736_v17, %s1327_s23 }
 0xcc6   :  { %v689_v18 = vpop.permute.xlu1 %688 }
 0xcc7   :  { %v691_v19 = vmul.f32 %v689_v18, %v685_v15 }
 0xcc9   :  { %693 = vrot.lane.b32.xlu0 %v691_v19, %s1327_s23 }
 0xd19   :  { %v739_v21 = vpop.permute.xlu2 %738 }
 0xd1a   :  { %v741_v22 = vadd.f32 %v739_v21, %v731_v20 }
 0xd1c   :  { %1142 = vtanh.f32 %v741_v22 }
 0xd22   :  { %v1143_v23 = vpop.eup %1142 }
 0xd23   :  { %744 = vrot.lane.b32.xlu1 %v1143_v23, %s1333_s3 }
 0xd3b   :  { %v694_v27 = vpop.permute.xlu0 %693 }
 0xd3c   :  { %v696_v28 = vadd.f32 %v694_v27, %v686_v25 }
 0xd3e   :  { %1144 = vtanh.f32 %v696_v28 }
 0xd44   :  { %v1145_v29 = vpop.eup %1144 }
 0xd45   :  { %699 = vrot.lane.b32.xlu2 %v1145_v29, %s1333_s3 }
 0xd95   :  { %v745_v30 = vpop.permute.xlu1 %744 }
 0xd96   :  { %v747_v31 = vmul.f32 %v745_v30, %v730_v11 }
 0xd98   :  { %749 = vrot.lane.b32.xlu0 %v747_v31, %s1327_s23 }
 0xd9f   :  { %v700_v32 = vpop.permute.xlu2 %699 }
 0xda0   :  { %v702_v33 = vmul.f32 %v700_v32, %v685_v15 }
 0xda2   :  { %753 = vrot.lane.b32.xlu1 %v702_v33, %s1333_s3 }
 0xe0a   :  { %v750_v34 = vpop.permute.xlu0 %749 }
 0xe0b   :  { %1081 = vmatmul.msk.f32.vlgmr.msra.gmra.mxu2 %vm221_vm4, %v750_v34 }
 0xe14   :  { %v754_v42 = vpop.permute.xlu1 %753 }
 0xe15   :  { %v756_v43 = vsel %vm221_vm4, %v750_v34, %v754_v42 }
 0xe16   :  { %1080 = vmatmul.msk.f32.vlgmr.msrb.gmra.mxu0 %vm271_vm5, %v756_v43 }
 0xe8e   :  { %v821_v46 = vpop.f32.mrf.mxu2 }
 0xe8f   :  { %v824_v12 = vadd.f32 %v821_v46, %v801_v45 }
 0xe91   :  { %1146 = vtanh.f32 %v824_v12 }
 0xe93   :  { %v777_v48 = vpop.f32.mrf.mxu0 }
 0xe94   :  { %v778_v49 = vadd.f32 %v1519_v47, %v777_v48 }
 0xe96   :  { %1148 = vtanh.f32 %v778_v49 }
 0xe97   :  { %v1147_v35 = vpop.eup %1146 }
 0xe98   :  { %v826_v36 = vmul.f32 %v1147_v35, %v1440_v24 }
 0xe9a   :  { %v827_v37 = vadd.f32 %v826_v36, %v1442_v26 }
 0xe9c   :  { %v1149_v38 = vpop.eup %1148  ;;  %830 = vrot.lane.b32.xlu0 %v827_v37, %s1333_s3  ;;  %v828_v52 = vmul.f32 %v827_v37, %v741_v22 }
 0xe9d   :  { %v781_v39 = vmul.f32 %v1149_v38, %v1440_v24 }
 0xe9f   :  { %v782_v40 = vadd.f32 %v781_v39, %v1442_v26 }
 0xea1   :  { %785 = vrot.lane.b32.xlu2 %v782_v40, %s1333_s3  ;;  %v783_v55 = vmul.f32 %v782_v40, %v696_v28 }
 0xefb   :  { %v786_v41 = vpop.permute.xlu2 %785 }
 0xefc   :  { %v788_v44 = vmul.f32 %v786_v41, %v782_v40  ;;  %v995_v41 = vld [vmem:[#allocation11 + $0x8] sm:$0xff] }
 0xefe   :  { %790 = vrot.lane.b32.xlu1 %v788_v44, %s1327_s23 }
 0xf0e   :  { %v831_v50 = vpop.permute.xlu0 %830 }
 0xf0f   :  { %v833_v51 = vmul.f32 %v831_v50, %v827_v37 }
 0xf11   :  { %835 = vrot.lane.b32.xlu2 %v833_v51, %s1327_s23  ;;  %v1101_v51 = vld [vmem:[%s1702_s7] ss:$0 sm:$0xff]  ;;  %s1334_s7 = smov [#allocation12]  }
 0xf12   :  { %s1054_s12 = sshll.u32 %s1334_s7, 4  ;;  %s1055_s12 = int_to_ptr.vmem [resolvable:$true] %s1054_s12 }
 0xf6b   :  { %v836_v53 = vpop.permute.xlu2 %835 }
 0xf6c   :  { %v838_v54 = vadd.f32 %v836_v53, %v828_v52 }
 0xf6e   :  { %1150 = vtanh.f32 %v838_v54 }
 0xf70   :  { %v791_v56 = vpop.permute.xlu1 %790 }
 0xf71   :  { %v793_v57 = vadd.f32 %v791_v56, %v783_v55 }
 0xf73   :  { %1152 = vtanh.f32 %v793_v57 }
 0xf74   :  { %v1151_v58 = vpop.eup %1150 }
 0xf75   :  { %841 = vrot.lane.b32.xlu1 %v1151_v58, %s1333_s3 }
 0xf79   :  { %v1153_v59 = vpop.eup %1152 }
 0xf7a   :  { %796 = vrot.lane.b32.xlu0 %v1153_v59, %s1333_s3 }
 0xfe7   :  { %v842_v60 = vpop.permute.xlu1 %841 }
 0xfe8   :  { %v844_v61 = vmul.f32 %v842_v60, %v827_v37 }
 0xfea   :  { %846 = vrot.lane.b32.xlu2 %v844_v61, %s1327_s23 }
 0xfec   :  { %v797_v62 = vpop.permute.xlu0 %796 }
 0xfed   :  { %v799_v63 = vmul.f32 %v797_v62, %v782_v40  ;;  %v996_v40 = vld [vmem:[#allocation11 + $0x10] sm:$0xff] }
 0xfef   :  { %850 = vrot.lane.b32.xlu0 %v799_v63, %s1333_s3 }
0x1044   :  { %v847_v0 = vpop.permute.xlu2 %846 }
0x1045   :  { %1083 = vmatmul.msk.f32.vlgmr.msra.gmra.mxu1 %vm221_vm4, %v847_v0 }
0x1061   :  { %v851_v2 = vpop.permute.xlu0 %850 }
0x1062   :  { %v853_v1 = vsel %vm221_vm4, %v847_v0, %v851_v2 }
0x1063   :  { %1082 = vmatmul.msk.f32.vlgmr.msrb.gmra.mxu3 %vm271_vm5, %v853_v1 }
0x10c2   :  { %v918_v4 = vpop.f32.mrf.mxu1 }
0x10c3   :  { %v921_v6 = vadd.f32 %v918_v4, %v898_v3 }
0x10c5   :  { %1154 = vtanh.f32 %v921_v6 }
0x10cb   :  { %v1155_v7 = vpop.eup %1154 }
0x10cc   :  { %v923_v5 = vmul.f32 %v1155_v7, %v1440_v24 }
0x10ce   :  { %v924_v8 = vadd.f32 %v923_v5, %v1442_v26 }
0x10d0   :  { %927 = vrot.lane.b32.xlu2 %v924_v8, %s1333_s3  ;;  %v925_v19 = vmul.f32 %v924_v8, %v838_v54 }
0x10e6   :  { %v874_v10 = vpop.f32.mrf.mxu3 }
0x10e7   :  { %v875_v9 = vadd.f32 %v1519_v47, %v874_v10 }
0x10e9   :  { %1156 = vtanh.f32 %v875_v9 }
0x10ef   :  { %v1157_v11 = vpop.eup %1156 }
0x10f0   :  { %v878_v13 = vmul.f32 %v1157_v11, %v1440_v24 }
0x10f2   :  { %v879_v14 = vadd.f32 %v878_v13, %v1442_v26 }
0x10f4   :  { %882 = vrot.lane.b32.xlu1 %v879_v14, %s1333_s3  ;;  %v880_v23 = vmul.f32 %v879_v14, %v793_v57 }
0x112a   :  { %v928_v15 = vpop.permute.xlu2 %927 }
0x112b   :  { %v930_v16 = vmul.f32 %v928_v15, %v924_v8 }
0x112d   :  { %932 = vrot.lane.b32.xlu1 %v930_v16, %s1327_s23 }
0x1166   :  { %v883_v17 = vpop.permute.xlu1 %882 }
0x1167   :  { %v885_v18 = vmul.f32 %v883_v17, %v879_v14 }
0x1169   :  { %887 = vrot.lane.b32.xlu0 %v885_v18, %s1327_s23 }
0x119f   :  { %v933_v20 = vpop.permute.xlu1 %932 }
0x11a0   :  { %v935_v21 = vadd.f32 %v933_v20, %v925_v19 }
0x11a2   :  { %1158 = vtanh.f32 %v935_v21 }
0x11a8   :  { %v1159_v22 = vpop.eup %1158 }
0x11a9   :  { %938 = vrot.lane.b32.xlu0 %v1159_v22, %s1333_s3 }
0x11db   :  { %v888_v25 = vpop.permute.xlu0 %887 }
0x11dc   :  { %v890_v27 = vadd.f32 %v888_v25, %v880_v23 }
0x11de   :  { %1160 = vtanh.f32 %v890_v27 }
0x11e4   :  { %v1161_v28 = vpop.eup %1160 }
0x11e5   :  { %893 = vrot.lane.b32.xlu2 %v1161_v28, %s1333_s3 }
0x121b   :  { %v939_v29 = vpop.permute.xlu0 %938 }
0x121c   :  { %v941_v30 = vmul.f32 %v939_v29, %v924_v8 }
0x121e   :  { %943 = vrot.lane.b32.xlu1 %v941_v30, %s1327_s23 }
0x123f   :  { %v894_v31 = vpop.permute.xlu2 %893 }
0x1240   :  { %v896_v32 = vmul.f32 %v894_v31, %v879_v14 }
0x1242   :  { %947 = vrot.lane.b32.xlu2 %v896_v32, %s1333_s3 }
0x1290   :  { %v944_v33 = vpop.permute.xlu1 %943 }
0x129c   :  { %v948_v34 = vpop.permute.xlu2 %947 }
0x129d   :  { %v950_v42 = vsel %vm221_vm4, %v944_v33, %v948_v34 }
0x129e   :  { %1084 = vmatmul.msk.f32.vlgmr.msrb.gmra.mxu2 %vm271_vm5, %v950_v42 }
0x1321   :  { %v971_v43 = vpop.f32.mrf.mxu2 }
0x1322   :  { %v972_v45 = vadd.f32 %v1519_v47, %v971_v43  ;;  %v997_v47 = vld [vmem:[#allocation11 + $0x18] sm:$0xff] }
0x1323   :  { %1019 = vmatpush.msra.mxu0 %v997_v47 }
0x1324   :  { %1162 = vtanh.f32 %v972_v45 }
0x1325   :  { %1020 = vmatpush.msra.mxu0 %v996_v40 }
0x1327   :  { %1021 = vmatpush.msra.mxu0 %v995_v41 }
0x132a   :  { %v1163_v46 = vpop.eup %1162 }
0x132b   :  { %v975_v12 = vmul.f32 %v1163_v46, %v1440_v24  ;;  %v994_v24 = vld [vmem:[#allocation11] sm:$0xff] }
0x132c   :  { %1022 = vmatpush.msra.mxu0 %v994_v24 }
0x132d   :  { %v976_v48 = vadd.f32 %v975_v12, %v1442_v26 }
0x132f   :  { %979 = vrot.lane.b32.xlu0 %v976_v48, %s1333_s3  ;;  %v977_v36 = vmul.f32 %v976_v48, %v890_v27 }
0x13a1   :  { %v980_v49 = vpop.permute.xlu0 %979 }
0x13a2   :  { %v982_v35 = vmul.f32 %v980_v49, %v976_v48 }
0x13a4   :  { %984 = vrot.lane.b32.xlu1 %v982_v35, %s1327_s23 }
0x1416   :  { %v985_v37 = vpop.permute.xlu1 %984 }
0x1417   :  { %v987_v38 = vadd.f32 %v985_v37, %v977_v36 }
0x1419   :  { %1164 = vtanh.f32 %v987_v38 }
0x141f   :  { %v1165_v39 = vpop.eup %1164 }
0x1420   :  { %990 = vrot.lane.b32.xlu2 %v1165_v39, %s1333_s3 }
0x147a   :  { %v991_v26 = vpop.permute.xlu2 %990 }
0x147b   :  { %v993_v44 = vmul.f32 %v991_v26, %v976_v48 }
0x147d   :  { %1003 = vrot.lane.b32.xlu0 %v993_v44, %s1327_s23 }
0x14ef   :  { %v1004_v50 = vpop.permute.xlu0 %1003 }
0x14f0   :  { %1085 = vmatmul.msk.f32.vlgmr.msra.gmra.mxu0 %vm221_vm4, %v1004_v50 }
0x156d   :  { %v1024_v52 = vpop.f32.mrf.mxu0 }
0x156e   :  { %v1025_v53 = vadd.f32 %v1101_v51, %v1024_v52 }
0x1570   :  { %v1027_v54 = vmax.f32 %v1025_v53, 0.0 }
0x1572   :  { %v1028_v55 = vmul.f32 %v1027_v54, %v1027_v54 }
0x1574   :  { %v1030_v56 = vsel %vm1029_vm6, %v1028_v55, 0.0 }
0x1575   :  { %1031 = vadd.xlane.f32.xlu1 %v1030_v56 }
0x15e8   :  { %v1032_v57 = vpop.xlane.xlu1 %1031 }
0x15e9   :  { %1166 = vrsqrt.f32 %v1032_v57  ;;  %vm1040_vm7 = vcmp.eq.f32.partialorder %v1032_v57, inf  ;;  %v1043_v2 = vand.u32 2147483648, %v1032_v57  ;;  %vm1042_vm8 = vcmp.eq.f32.partialorder %v1032_v57, 0.0 }
0x15ef   :  { %v1167_v58 = vpop.eup %1166 }
0x15f0   :  { %v1034_v59 = vmul.f32 %v1167_v58, %v1032_v57 }
0x15f2   :  { %v1035_v60 = vmul.f32 %v1167_v58, %v1034_v59 }
0x15f4   :  { %v1036_v61 = vmul.f32 0.5, %v1035_v60 }
0x15f6   :  { %v1037_v62 = vsub.f32 1.5, %v1036_v61 }
0x15f8   :  { %v1038_v63 = vmul.f32 %v1167_v58, %v1037_v62 }
0x15fa   :  { %v1039_v0 = vmul.f32 %v1038_v63, %v1032_v57 }
0x15fc   :  { %v1041_v1 = vsel %vm1040_vm7, %v1032_v57, %v1039_v0 }
0x15fd   :  { %v1044_v3 = vsel %vm1042_vm8, %v1043_v2, %v1041_v1 }
0x15fe   :  { %v1045_v4 = vadd.f32 1e-05, %v1044_v3 }
0x1600   :  { %1168 = vrcp.f32 %v1045_v4 }
0x1606   :  { %v1169_v6 = vpop.eup %1168 }
0x1607   :  { %v1047_v7 = vmul.f32 %v1169_v6, %v1027_v54 }
0x1609   :  { %1048 = vst.msk [vmem:[#allocation12] sm:$0x3] %vm1029_vm6, %v1047_v7 }
0x160a   :  { %1059 = dma.vmem_to_hbm [thread:$0]  %s1055_s12, 32, %s1057_s15, [#allocation5]  }
0x160b   :  { %1320 = dma.done.wait [#allocation5], 32  }
0x160c   :  { %1321 = vsyncadd [#allocation5], 4294967264 }
0x160d   :  { %1064 = vsyncpa [#allocation4], 1 }
0x160e   :  { %1065 = vsyncpa [#allocation7], 1 }
0x160f   :  { %1066 = vsyncpa [#allocation10], 1 }
0x1610   :  { %1067 = vsyncpa [#allocation5], 1 }

</bundles_post_ra>
